<compile_context>
chip_gen: v5e
topology: v5e:2x2
jax: 0.10.0
libtpu: 0.0.40
codegen_flags: <defaults>
</compile_context>

<pallas_src>
import jax
import jax.numpy as jnp
from jax.experimental import pallas as pl
from jax.experimental.pallas import tpu as pltpu


# ----------------------------------------------------------------------------
# Generation-aware VMEM budget (v7x: 64 MiB physical; v5e/v6e: 128 MiB)
# ----------------------------------------------------------------------------
def _vmem_budget_bytes():
    try:
        cap = pltpu.get_tpu_info().vmem_capacity_bytes
    except Exception:
        cap = 64 * 1024 * 1024
    if cap >= 128 * 1024 * 1024:          # v5e / v6e
        return 96 * 1024 * 1024
    return 48 * 1024 * 1024               # v7x: leave headroom under 64 MiB


_VMEM_BUDGET = _vmem_budget_bytes()


# ----------------------------------------------------------------------------
# Pallas kernel: fused 3x3 / stride-2 / pad-1 conv + bias + ReLU (one row tile)
# ----------------------------------------------------------------------------
def _conv3x3_s2_kernel(ph_ref, halo_ref, w_ref, b_ref, o_ref):
    # ph_ref  : (4, TH, Wh, Cin)  bf16 -- row block of the 2x2 phase split;
    #           phases[2a+b][i, j] == x_pad[2i+a, 2j+b];  Wh = Wo + 1.
    # halo_ref: (4, 1,  Wh, Cin)  bf16 -- the single extra phase row the block needs.
    # w_ref   : (9*Cin, Cout)     bf16 -- row index = (kh*3+kw)*Cin + ci.
    # b_ref   : (1, Cout)         f32.
    # o_ref   : (TH, Wo, Cout)    bf16, lane-dense (Cout % 128 == 0).
    th, wo, cout = o_ref.shape
    cin = ph_ref.shape[-1]
    ph = jnp.concatenate([ph_ref[...], halo_ref[...]], axis=1)   # (4, TH+1, Wh, Cin)
    taps = []
    for kh in range(3):                                          # static 9-tap unroll
        for kw in range(3):
            p = 2 * (kh % 2) + (kw % 2)
            dh, dw = kh // 2, kw // 2
            taps.append(ph[p, dh:dh + th, dw:dw + wo, :].reshape(th * wo, cin))
    lhs = jnp.concatenate(taps, axis=-1)                         # (TH*Wo, 9*Cin) bf16
    acc = jnp.dot(lhs, w_ref[...], preferred_element_type=jnp.float32)
    acc = jnp.maximum(acc + b_ref[...], 0.0)
    o_ref[...] = acc.reshape(th, wo, cout).astype(o_ref.dtype)


def _phase_split(x_pad):
    """(N, Hp, Wp, C) with even Hp, Wp -> (N, 4, Hp//2, Wp//2, C);
    out[n, 2a+b, i, j] == x_pad[n, 2i+a, 2j+b] (space-to-depth, ~1x data pass)."""
    n, hp, wp, c = x_pad.shape
    r = x_pad.reshape(n, hp // 2, 2, wp // 2, 2, c)
    r = jnp.transpose(r, (0, 2, 4, 1, 3, 5))                     # (N, 2, 2, Hh, Wh, C)
    return r.reshape(n, 4, hp // 2, wp // 2, c)


def _pick_row_tile(ho, wo, wh, cin, cout, budget):
    """Largest divisor of Ho whose double-buffered block footprint fits ~budget/2."""
    cin_l = max(cin, 128)                  # minor dim lane-padded to 128 in VMEM
    k_l = max(9 * cin, 128)
    per_row = (2 * 4 * wh * cin_l * 2      # 2x buffered phases block (bf16)
               + 2 * wo * cout * 2         # 2x buffered bf16 output block
               + wo * k_l * 2              # in-kernel (TH*Wo, 9*Cin) LHS
               + wo * cout * 4)            # f32 accumulator
    fixed = 9 * cin * cout * 2 * 2 + cout * 8 + (1 << 20)
    th = max(1, int((budget // 2 - fixed) // max(per_row, 1)))
    th = min(th, ho)
    while ho % th:                         # keep blocks exact
        th -= 1
    return th


def conv3x3_s2_bias_relu(x_nhwc, w_hwio, bias):
    """3x3, stride-2, pad-1 conv + bias + ReLU; single-matmul Pallas hot path.

    x: (N, H, W, Cin), even H/W, Cin % 8 == 0; w: (3, 3, Cin, Cout), Cout % 128 == 0.
    Returns bf16 NHWC features (f32 accumulation inside the kernel).
    """
    n, h, w, cin = x_nhwc.shape
    kh, kw, wcin, cout = w_hwio.shape
    assert (kh, kw) == (3, 3) and wcin == cin
    assert h % 2 == 0 and w % 2 == 0 and cin % 8 == 0 and cout % 128 == 0
    ho, wo = h // 2, w // 2
    wh = wo + 1

    # TODO(synk): the pad + phase-split + cast is one extra XLA data pass per
    # layer; it could be folded into the kernel via overlapping row windows on
    # the raw NHWC activation with in-kernel column-halo handling.
    x_pad = jnp.pad(x_nhwc, ((0, 0), (1, 1), (1, 1), (0, 0)))
    phases = _phase_split(x_pad).astype(jnp.bfloat16)            # (N, 4, Hh, Wh, Cin)
    w2d = w_hwio.reshape(9 * cin, cout).astype(jnp.bfloat16)     # (9*Cin, Cout)
    b2 = bias.reshape(1, cout).astype(jnp.float32)

    th = _pick_row_tile(ho, wo, wh, cin, cout, _VMEM_BUDGET)
    grid = (n, ho // th)

    flops = 2 * n * ho * wo * 9 * cin * cout
    bytes_accessed = (phases.size * 2 + w2d.size * 2 * grid[1] + b2.size * 4
                      + n * ho * wo * cout * 2)

    return pl.pallas_call(
        _conv3x3_s2_kernel,
        out_shape=jax.ShapeDtypeStruct((n, ho, wo, cout), jnp.bfloat16),
        grid=grid,
        in_specs=[
            # main row block: phase rows [j*TH, j*TH + TH)
            pl.BlockSpec((None, 4, th, wh, cin), lambda i, j: (i, 0, j, 0, 0)),
            # 1-row halo: phase row (j+1)*TH  (block size 1 => block idx == row idx)
            pl.BlockSpec((None, 4, 1, wh, cin),
                         lambda i, j: (i, 0, (j + 1) * th, 0, 0)),
            pl.BlockSpec((9 * cin, cout), lambda i, j: (0, 0)),
            pl.BlockSpec((1, cout), lambda i, j: (0, 0)),
        ],
        out_specs=pl.BlockSpec((None, th, wo, cout), lambda i, j: (i, j, 0, 0)),
        compiler_params=pltpu.CompilerParams(
            dimension_semantics=("parallel", "parallel"),
            vmem_limit_bytes=_VMEM_BUDGET),
        cost_estimate=pl.CostEstimate(flops=flops, transcendentals=0,
                                      bytes_accessed=bytes_accessed),
    )(phases, phases, w2d, b2)


# ----------------------------------------------------------------------------
# Nearest mask interpolation (strided slice for integer strides; no kernel)
# ----------------------------------------------------------------------------
def nearest_mask(mask_bool, h_out, w_out):
    """F.interpolate(mask[None].float(), size=(h_out, w_out)).to(bool)[0] for a
    0/1 mask == nearest gather src = floor(dst * in / out); for integer strides
    that is exactly a strided slice.  (PyTorch 'nearest', not 'nearest-exact'.)"""
    _, h_in, w_in = mask_bool.shape
    if h_in % h_out == 0 and w_in % w_out == 0:
        return mask_bool[:, ::h_in // h_out, ::w_in // w_out]
    src_h = (jnp.arange(h_out) * h_in) // h_out
    src_w = (jnp.arange(w_out) * w_in) // w_out
    return jnp.take(jnp.take(mask_bool, src_h, axis=1), src_w, axis=2)


def _round_up(x, m):
    return ((x + m - 1) // m) * m


# ----------------------------------------------------------------------------
# MaskedBackbone
# ----------------------------------------------------------------------------
class MaskedBackbone:
    """Thin wrapper around a synthetic backbone providing padding masking."""
    # TODO(synk): D2's build_backbone(cfg) (ResNet/FPN) is replaced by a synthetic
    # 2-level conv backbone; NestedTensor is represented as a (tensor, mask) tuple.

    def __init__(self, cin=4, c1=32, c2=32, key=jax.random.PRNGKey(0)):
        k1, k2, k3, k4 = jax.random.split(key, 4)
        self.c1, self.c2 = c1, c2
        self.w1 = 0.1 * jax.random.normal(k1, (3, 3, cin, c1), jnp.float32)
        self.b1 = 0.1 * jax.random.normal(k2, (c1,), jnp.float32)
        self.w2 = 0.1 * jax.random.normal(k3, (3, 3, c1, c2), jnp.float32)
        self.b2 = 0.1 * jax.random.normal(k4, (c2,), jnp.float32)
        self.feature_strides = [2, 4]
        self.num_channels = [c1, c2]

        # TPU-friendly zero-padded params: cin -> mult. of 8 (aligned MXU K),
        # cout -> mult. of 128 (lane-dense stores, full MXU columns).  Padding
        # is exact: padded weights/bias are zero and ReLU keeps them zero.
        self.cin_p = _round_up(cin, 8)
        self.c1_in_p = _round_up(c1, 8)                 # stage-2 K uses real c1 only
        c1_p, c2_p = _round_up(c1, 128), _round_up(c2, 128)
        self.w1_p = jnp.pad(self.w1, ((0, 0), (0, 0),
                                      (0, self.cin_p - cin), (0, c1_p - c1)))
        self.b1_p = jnp.pad(self.b1, (0, c1_p - c1))
        self.w2_p = jnp.pad(self.w2, ((0, 0), (0, 0),
                                      (0, self.c1_in_p - c1), (0, c2_p - c2)))
        self.b2_p = jnp.pad(self.b2, (0, c2_p - c2))
        self._forward = jax.jit(self._forward_impl)

    def _forward_impl(self, tensors_nchw, mask_nhw_bool):
        # NCHW -> NHWC once; features stay NHWC (lane dim = C) internally.
        x = jnp.transpose(tensors_nchw, (0, 2, 3, 1))
        if x.shape[-1] < self.cin_p:
            x = jnp.pad(x, ((0, 0), (0, 0), (0, 0), (0, self.cin_p - x.shape[-1])))
        f1 = conv3x3_s2_bias_relu(x, self.w1_p, self.b1_p)        # (N, H/2, W/2, 128) bf16
        f1_real = f1[..., :self.c1_in_p]                          # drop guaranteed-zero lanes
        f2 = conv3x3_s2_bias_relu(f1_real, self.w2_p, self.b2_p)  # (N, H/4, W/4, 128) bf16

        out = {}
        for name, (f, c) in (("p1", (f1, self.c1)), ("p2", (f2, self.c2))):
            feat = jnp.transpose(f[..., :c], (0, 3, 1, 2)).astype(jnp.float32)
            mask_l = nearest_mask(mask_nhw_bool, f.shape[1], f.shape[2])
            out[name] = (feat, mask_l)                            # NestedTensor(x, mask)
        return out

    def __call__(self, tensors_nchw, mask_nhw_bool):
        return self._forward(tensors_nchw, mask_nhw_bool)


if __name__ == "__main__":
    key = jax.random.PRNGKey(0)
    k_img, k_par = jax.random.split(key)

    N, C, H, W = 2, 4, 16, 16
    images = jax.random.normal(k_img, (N, C, H, W), jnp.float32)

    # Padding mask: True where padded.  Image 0 valid 12x10, image 1 valid 16x14.
    hh = jnp.arange(H)[None, :, None]
    ww = jnp.arange(W)[None, None, :]
    valid_h = jnp.array([12, 16])[:, None, None]
    valid_w = jnp.array([10, 14])[:, None, None]
    mask = (hh >= valid_h) | (ww >= valid_w)                      # (N, H, W) bool

    model = MaskedBackbone(cin=C, c1=32, c2=32, key=k_par)
    out = model(images, mask)
    out = jax.block_until_ready(out)

    # Shape / dtype checks.
    assert out["p1"][0].shape == (N, 32, 8, 8)
    assert out["p1"][1].shape == (N, 8, 8) and out["p1"][1].dtype == jnp.bool_
    assert out["p2"][0].shape == (N, 32, 4, 4)
    assert out["p2"][1].shape == (N, 4, 4) and out["p2"][1].dtype == jnp.bool_

    # Numerical check against a pure-XLA f32 reference of the same backbone.
    def ref_conv(x_nhwc, w, b):
        y = jax.lax.conv_general_dilated(
            x_nhwc, w, window_strides=(2, 2), padding=((1, 1), (1, 1)),
            dimension_numbers=("NHWC", "HWIO", "NHWC"))
        return jnp.maximum(y + b, 0.0)

    x_nhwc = jnp.transpose(images, (0, 2, 3, 1))
    ref_f1 = ref_conv(x_nhwc, model.w1, model.b1)
    ref_f2 = ref_conv(ref_f1, model.w2, model.b2)
    assert jnp.allclose(out["p1"][0], jnp.transpose(ref_f1, (0, 3, 1, 2)),
                        atol=0.1, rtol=0.1)
    assert jnp.allclose(out["p2"][0], jnp.transpose(ref_f2, (0, 3, 1, 2)),
                        atol=0.1, rtol=0.1)
    assert bool(jnp.all(out["p1"][1] == mask[:, ::2, ::2]))
    assert bool(jnp.all(out["p2"][1] == mask[:, ::4, ::4]))

    print("KERNEL_OK")
</pallas_src>

<mosaic_0001>
module attributes {stable_mosaic.version = 11 : i64} {
  func.func @_conv3x3_s2_kernel(%arg0: i32, %arg1: i32, %arg2: memref<1x4x8x9x8xbf16, #tpu.memory_space<vmem>>, %arg3: memref<1x4x1x9x8xbf16, #tpu.memory_space<vmem>>, %arg4: memref<72x128xbf16, #tpu.memory_space<vmem>>, %arg5: memref<1x128xf32, #tpu.memory_space<vmem>>, %arg6: memref<1x8x8x128xbf16, #tpu.memory_space<vmem>>) attributes {dimension_semantics = [#tpu.dimension_semantics<parallel>, #tpu.dimension_semantics<parallel>], iteration_bounds = array<i64: 2, 1>, scalar_prefetch = 0 : i64, scratch_operands = 0 : i64, tpu.core_type = #tpu.core_type<tc>, window_params = [{transform_indices = @transform_0, window_bounds = array<i64: 1, 4, 8, 9, 8>}, {transform_indices = @transform_1, window_bounds = array<i64: 1, 4, 1, 9, 8>}, {pipeline_mode = #tpu.pipeline_mode<synchronous>, transform_indices = @transform_2, window_bounds = array<i64: 72, 128>}, {pipeline_mode = #tpu.pipeline_mode<synchronous>, transform_indices = @transform_3, window_bounds = array<i64: 1, 128>}, {transform_indices = @transform_4, window_bounds = array<i64: 1, 8, 8, 128>}]} {
    %c0 = arith.constant 0 : index
    %c0_0 = arith.constant 0 : index
    %c0_1 = arith.constant 0 : index
    %c0_2 = arith.constant 0 : index
    %c0_3 = arith.constant 0 : index
    %0 = vector.load %arg2[%c0, %c0_0, %c0_1, %c0_2, %c0_3] : memref<1x4x8x9x8xbf16, #tpu.memory_space<vmem>>, vector<1x4x8x9x8xbf16>
    %1 = vector.shape_cast %0 : vector<1x4x8x9x8xbf16> to vector<4x8x9x8xbf16>
    %c0_4 = arith.constant 0 : index
    %c0_5 = arith.constant 0 : index
    %c0_6 = arith.constant 0 : index
    %c0_7 = arith.constant 0 : index
    %c0_8 = arith.constant 0 : index
    %2 = vector.load %arg3[%c0_4, %c0_5, %c0_6, %c0_7, %c0_8] : memref<1x4x1x9x8xbf16, #tpu.memory_space<vmem>>, vector<1x4x1x9x8xbf16>
    %3 = vector.shape_cast %2 : vector<1x4x1x9x8xbf16> to vector<4x1x9x8xbf16>
    %4 = tpu.concatenate %1, %3 in 1 : vector<4x8x9x8xbf16>, vector<4x1x9x8xbf16> -> vector<4x9x9x8xbf16>
    %5 = vector.extract_strided_slice %4 {offsets = [0, 0, 0, 0], sizes = [1, 8, 8, 8], strides = [1, 1, 1, 1]} : vector<4x9x9x8xbf16> to vector<1x8x8x8xbf16>
    %6 = vector.shape_cast %5 : vector<1x8x8x8xbf16> to vector<8x8x8xbf16>
    %7 = vector.shape_cast %6 : vector<8x8x8xbf16> to vector<64x8xbf16>
    %8 = vector.extract_strided_slice %4 {offsets = [1, 0, 0, 0], sizes = [1, 8, 8, 8], strides = [1, 1, 1, 1]} : vector<4x9x9x8xbf16> to vector<1x8x8x8xbf16>
    %9 = vector.shape_cast %8 : vector<1x8x8x8xbf16> to vector<8x8x8xbf16>
    %10 = vector.shape_cast %9 : vector<8x8x8xbf16> to vector<64x8xbf16>
    %11 = vector.extract_strided_slice %4 {offsets = [0, 0, 1, 0], sizes = [1, 8, 8, 8], strides = [1, 1, 1, 1]} : vector<4x9x9x8xbf16> to vector<1x8x8x8xbf16>
    %12 = vector.shape_cast %11 : vector<1x8x8x8xbf16> to vector<8x8x8xbf16>
    %13 = vector.shape_cast %12 : vector<8x8x8xbf16> to vector<64x8xbf16>
    %14 = vector.extract_strided_slice %4 {offsets = [2, 0, 0, 0], sizes = [1, 8, 8, 8], strides = [1, 1, 1, 1]} : vector<4x9x9x8xbf16> to vector<1x8x8x8xbf16>
    %15 = vector.shape_cast %14 : vector<1x8x8x8xbf16> to vector<8x8x8xbf16>
    %16 = vector.shape_cast %15 : vector<8x8x8xbf16> to vector<64x8xbf16>
    %17 = vector.extract_strided_slice %4 {offsets = [3, 0, 0, 0], sizes = [1, 8, 8, 8], strides = [1, 1, 1, 1]} : vector<4x9x9x8xbf16> to vector<1x8x8x8xbf16>
    %18 = vector.shape_cast %17 : vector<1x8x8x8xbf16> to vector<8x8x8xbf16>
    %19 = vector.shape_cast %18 : vector<8x8x8xbf16> to vector<64x8xbf16>
    %20 = vector.extract_strided_slice %4 {offsets = [2, 0, 1, 0], sizes = [1, 8, 8, 8], strides = [1, 1, 1, 1]} : vector<4x9x9x8xbf16> to vector<1x8x8x8xbf16>
    %21 = vector.shape_cast %20 : vector<1x8x8x8xbf16> to vector<8x8x8xbf16>
    %22 = vector.shape_cast %21 : vector<8x8x8xbf16> to vector<64x8xbf16>
    %23 = vector.extract_strided_slice %4 {offsets = [0, 1, 0, 0], sizes = [1, 8, 8, 8], strides = [1, 1, 1, 1]} : vector<4x9x9x8xbf16> to vector<1x8x8x8xbf16>
    %24 = vector.shape_cast %23 : vector<1x8x8x8xbf16> to vector<8x8x8xbf16>
    %25 = vector.shape_cast %24 : vector<8x8x8xbf16> to vector<64x8xbf16>
    %26 = vector.extract_strided_slice %4 {offsets = [1, 1, 0, 0], sizes = [1, 8, 8, 8], strides = [1, 1, 1, 1]} : vector<4x9x9x8xbf16> to vector<1x8x8x8xbf16>
    %27 = vector.shape_cast %26 : vector<1x8x8x8xbf16> to vector<8x8x8xbf16>
    %28 = vector.shape_cast %27 : vector<8x8x8xbf16> to vector<64x8xbf16>
    %29 = vector.extract_strided_slice %4 {offsets = [0, 1, 1, 0], sizes = [1, 8, 8, 8], strides = [1, 1, 1, 1]} : vector<4x9x9x8xbf16> to vector<1x8x8x8xbf16>
    %30 = vector.shape_cast %29 : vector<1x8x8x8xbf16> to vector<8x8x8xbf16>
    %31 = vector.shape_cast %30 : vector<8x8x8xbf16> to vector<64x8xbf16>
    %32 = tpu.concatenate %7, %10, %13, %16, %19, %22, %25, %28, %31 in 1 : vector<64x8xbf16>, vector<64x8xbf16>, vector<64x8xbf16>, vector<64x8xbf16>, vector<64x8xbf16>, vector<64x8xbf16>, vector<64x8xbf16>, vector<64x8xbf16>, vector<64x8xbf16> -> vector<64x72xbf16>
    %c0_9 = arith.constant 0 : index
    %c0_10 = arith.constant 0 : index
    %33 = vector.load %arg4[%c0_9, %c0_10] : memref<72x128xbf16, #tpu.memory_space<vmem>>, vector<72x128xbf16>
    %cst = arith.constant dense<0.000000e+00> : vector<64x128xf32>
    %34 = tpu.matmul %32, %33, %cst {dimension_numbers = #tpu.dot_dimension_numbers<[1], [0], [0], [1], [0, 0, 1, 1], [], []>} : vector<64x72xbf16>, vector<72x128xbf16>, vector<64x128xf32> -> vector<64x128xf32>
    %c0_11 = arith.constant 0 : index
    %c0_12 = arith.constant 0 : index
    %35 = vector.load %arg5[%c0_11, %c0_12] : memref<1x128xf32, #tpu.memory_space<vmem>>, vector<1x128xf32>
    %36 = vector.broadcast %35 : vector<1x128xf32> to vector<64x128xf32>
    %37 = arith.addf %34, %36 : vector<64x128xf32>
    %cst_13 = arith.constant 0.000000e+00 : f32
    %38 = vector.broadcast %cst_13 : f32 to vector<64x128xf32>
    %39 = arith.maximumf %37, %38 : vector<64x128xf32>
    %40 = vector.shape_cast %39 : vector<64x128xf32> to vector<8x8x128xf32>
    %41 = arith.truncf %40 : vector<8x8x128xf32> to vector<8x8x128xbf16>
    %c0_14 = arith.constant 0 : index
    %c0_15 = arith.constant 0 : index
    %c0_16 = arith.constant 0 : index
    %c0_17 = arith.constant 0 : index
    %42 = vector.load %arg6[%c0_14, %c0_15, %c0_16, %c0_17] : memref<1x8x8x128xbf16, #tpu.memory_space<vmem>>, vector<1x8x8x128xbf16>
    %43 = vector.shape_cast %42 : vector<1x8x8x128xbf16> to vector<8x8x128xbf16>
    %44 = vector.shape_cast %41 : vector<8x8x128xbf16> to vector<1x8x8x128xbf16>
    tpu.vector_store %arg6[%c0_14, %c0_15, %c0_16, %c0_17], %44 {strides = array<i32>} : memref<1x8x8x128xbf16, #tpu.memory_space<vmem>>, vector<1x8x8x128xbf16>,
    return
  }
  func.func @transform_0(%arg0: i32, %arg1: i32) -> (i32, i32, i32, i32, i32) {
    %c0_i32 = arith.constant 0 : i32
    %c0_i32_0 = arith.constant 0 : i32
    %c0_i32_1 = arith.constant 0 : i32
    %c0_i32_2 = arith.constant 0 : i32
    return %arg0, %c0_i32, %arg1, %c0_i32_0, %c0_i32_1 : i32, i32, i32, i32, i32
  }
  func.func @transform_1(%arg0: i32, %arg1: i32) -> (i32, i32, i32, i32, i32) {
    %c1_i32 = arith.constant 1 : i32
    %0 = arith.addi %arg1, %c1_i32 : i32
    %c8_i32 = arith.constant 8 : i32
    %1 = arith.muli %0, %c8_i32 : i32
    %c0_i32 = arith.constant 0 : i32
    %c0_i32_0 = arith.constant 0 : i32
    %c0_i32_1 = arith.constant 0 : i32
    %c0_i32_2 = arith.constant 0 : i32
    return %arg0, %c0_i32, %1, %c0_i32_0, %c0_i32_1 : i32, i32, i32, i32, i32
  }
  func.func @transform_2(%arg0: i32, %arg1: i32) -> (i32, i32) {
    %c0_i32 = arith.constant 0 : i32
    %c0_i32_0 = arith.constant 0 : i32
    %c0_i32_1 = arith.constant 0 : i32
    return %c0_i32, %c0_i32_0 : i32, i32
  }
  func.func @transform_3(%arg0: i32, %arg1: i32) -> (i32, i32) {
    %c0_i32 = arith.constant 0 : i32
    %c0_i32_0 = arith.constant 0 : i32
    %c0_i32_1 = arith.constant 0 : i32
    return %c0_i32, %c0_i32_0 : i32, i32
  }
  func.func @transform_4(%arg0: i32, %arg1: i32) -> (i32, i32, i32, i32) {
    %c0_i32 = arith.constant 0 : i32
    %c0_i32_0 = arith.constant 0 : i32
    %c0_i32_1 = arith.constant 0 : i32
    return %arg0, %arg1, %c0_i32, %c0_i32_0 : i32, i32, i32, i32
  }
}

module attributes {stable_mosaic.version = 11 : i64} {
  func.func @_conv3x3_s2_kernel(%arg0: i32, %arg1: i32, %arg2: memref<1x4x4x5x32xbf16, #tpu.memory_space<vmem>>, %arg3: memref<1x4x1x5x32xbf16, #tpu.memory_space<vmem>>, %arg4: memref<288x128xbf16, #tpu.memory_space<vmem>>, %arg5: memref<1x128xf32, #tpu.memory_space<vmem>>, %arg6: memref<1x4x4x128xbf16, #tpu.memory_space<vmem>>) attributes {dimension_semantics = [#tpu.dimension_semantics<parallel>, #tpu.dimension_semantics<parallel>], iteration_bounds = array<i64: 2, 1>, scalar_prefetch = 0 : i64, scratch_operands = 0 : i64, tpu.core_type = #tpu.core_type<tc>, window_params = [{transform_indices = @transform_0, window_bounds = array<i64: 1, 4, 4, 5, 32>}, {transform_indices = @transform_1, window_bounds = array<i64: 1, 4, 1, 5, 32>}, {pipeline_mode = #tpu.pipeline_mode<synchronous>, transform_indices = @transform_2, window_bounds = array<i64: 288, 128>}, {pipeline_mode = #tpu.pipeline_mode<synchronous>, transform_indices = @transform_3, window_bounds = array<i64: 1, 128>}, {transform_indices = @transform_4, window_bounds = array<i64: 1, 4, 4, 128>}]} {
    %c0 = arith.constant 0 : index
    %c0_0 = arith.constant 0 : index
    %c0_1 = arith.constant 0 : index
    %c0_2 = arith.constant 0 : index
    %c0_3 = arith.constant 0 : index
    %0 = vector.load %arg2[%c0, %c0_0, %c0_1, %c0_2, %c0_3] : memref<1x4x4x5x32xbf16, #tpu.memory_space<vmem>>, vector<1x4x4x5x32xbf16>
    %1 = vector.shape_cast %0 : vector<1x4x4x5x32xbf16> to vector<4x4x5x32xbf16>
    %c0_4 = arith.constant 0 : index
    %c0_5 = arith.constant 0 : index
    %c0_6 = arith.constant 0 : index
    %c0_7 = arith.constant 0 : index
    %c0_8 = arith.constant 0 : index
    %2 = vector.load %arg3[%c0_4, %c0_5, %c0_6, %c0_7, %c0_8] : memref<1x4x1x5x32xbf16, #tpu.memory_space<vmem>>, vector<1x4x1x5x32xbf16>
    %3 = vector.shape_cast %2 : vector<1x4x1x5x32xbf16> to vector<4x1x5x32xbf16>
    %4 = tpu.concatenate %1, %3 in 1 : vector<4x4x5x32xbf16>, vector<4x1x5x32xbf16> -> vector<4x5x5x32xbf16>
    %5 = vector.extract_strided_slice %4 {offsets = [0, 0, 0, 0], sizes = [1, 4, 4, 32], strides = [1, 1, 1, 1]} : vector<4x5x5x32xbf16> to vector<1x4x4x32xbf16>
    %6 = vector.shape_cast %5 : vector<1x4x4x32xbf16> to vector<4x4x32xbf16>
    %7 = vector.shape_cast %6 : vector<4x4x32xbf16> to vector<16x32xbf16>
    %8 = vector.extract_strided_slice %4 {offsets = [1, 0, 0, 0], sizes = [1, 4, 4, 32], strides = [1, 1, 1, 1]} : vector<4x5x5x32xbf16> to vector<1x4x4x32xbf16>
    %9 = vector.shape_cast %8 : vector<1x4x4x32xbf16> to vector<4x4x32xbf16>
    %10 = vector.shape_cast %9 : vector<4x4x32xbf16> to vector<16x32xbf16>
    %11 = vector.extract_strided_slice %4 {offsets = [0, 0, 1, 0], sizes = [1, 4, 4, 32], strides = [1, 1, 1, 1]} : vector<4x5x5x32xbf16> to vector<1x4x4x32xbf16>
    %12 = vector.shape_cast %11 : vector<1x4x4x32xbf16> to vector<4x4x32xbf16>
    %13 = vector.shape_cast %12 : vector<4x4x32xbf16> to vector<16x32xbf16>
    %14 = vector.extract_strided_slice %4 {offsets = [2, 0, 0, 0], sizes = [1, 4, 4, 32], strides = [1, 1, 1, 1]} : vector<4x5x5x32xbf16> to vector<1x4x4x32xbf16>
    %15 = vector.shape_cast %14 : vector<1x4x4x32xbf16> to vector<4x4x32xbf16>
    %16 = vector.shape_cast %15 : vector<4x4x32xbf16> to vector<16x32xbf16>
    %17 = vector.extract_strided_slice %4 {offsets = [3, 0, 0, 0], sizes = [1, 4, 4, 32], strides = [1, 1, 1, 1]} : vector<4x5x5x32xbf16> to vector<1x4x4x32xbf16>
    %18 = vector.shape_cast %17 : vector<1x4x4x32xbf16> to vector<4x4x32xbf16>
    %19 = vector.shape_cast %18 : vector<4x4x32xbf16> to vector<16x32xbf16>
    %20 = vector.extract_strided_slice %4 {offsets = [2, 0, 1, 0], sizes = [1, 4, 4, 32], strides = [1, 1, 1, 1]} : vector<4x5x5x32xbf16> to vector<1x4x4x32xbf16>
    %21 = vector.shape_cast %20 : vector<1x4x4x32xbf16> to vector<4x4x32xbf16>
    %22 = vector.shape_cast %21 : vector<4x4x32xbf16> to vector<16x32xbf16>
    %23 = vector.extract_strided_slice %4 {offsets = [0, 1, 0, 0], sizes = [1, 4, 4, 32], strides = [1, 1, 1, 1]} : vector<4x5x5x32xbf16> to vector<1x4x4x32xbf16>
    %24 = vector.shape_cast %23 : vector<1x4x4x32xbf16> to vector<4x4x32xbf16>
    %25 = vector.shape_cast %24 : vector<4x4x32xbf16> to vector<16x32xbf16>
    %26 = vector.extract_strided_slice %4 {offsets = [1, 1, 0, 0], sizes = [1, 4, 4, 32], strides = [1, 1, 1, 1]} : vector<4x5x5x32xbf16> to vector<1x4x4x32xbf16>
    %27 = vector.shape_cast %26 : vector<1x4x4x32xbf16> to vector<4x4x32xbf16>
    %28 = vector.shape_cast %27 : vector<4x4x32xbf16> to vector<16x32xbf16>
    %29 = vector.extract_strided_slice %4 {offsets = [0, 1, 1, 0], sizes = [1, 4, 4, 32], strides = [1, 1, 1, 1]} : vector<4x5x5x32xbf16> to vector<1x4x4x32xbf16>
    %30 = vector.shape_cast %29 : vector<1x4x4x32xbf16> to vector<4x4x32xbf16>
    %31 = vector.shape_cast %30 : vector<4x4x32xbf16> to vector<16x32xbf16>
    %32 = tpu.concatenate %7, %10, %13, %16, %19, %22, %25, %28, %31 in 1 : vector<16x32xbf16>, vector<16x32xbf16>, vector<16x32xbf16>, vector<16x32xbf16>, vector<16x32xbf16>, vector<16x32xbf16>, vector<16x32xbf16>, vector<16x32xbf16>, vector<16x32xbf16> -> vector<16x288xbf16>
    %c0_9 = arith.constant 0 : index
    %c0_10 = arith.constant 0 : index
    %33 = vector.load %arg4[%c0_9, %c0_10] : memref<288x128xbf16, #tpu.memory_space<vmem>>, vector<288x128xbf16>
    %cst = arith.constant dense<0.000000e+00> : vector<16x128xf32>
    %34 = tpu.matmul %32, %33, %cst {dimension_numbers = #tpu.dot_dimension_numbers<[1], [0], [0], [1], [0, 0, 1, 1], [], []>} : vector<16x288xbf16>, vector<288x128xbf16>, vector<16x128xf32> -> vector<16x128xf32>
    %c0_11 = arith.constant 0 : index
    %c0_12 = arith.constant 0 : index
    %35 = vector.load %arg5[%c0_11, %c0_12] : memref<1x128xf32, #tpu.memory_space<vmem>>, vector<1x128xf32>
    %36 = vector.broadcast %35 : vector<1x128xf32> to vector<16x128xf32>
    %37 = arith.addf %34, %36 : vector<16x128xf32>
    %cst_13 = arith.constant 0.000000e+00 : f32
    %38 = vector.broadcast %cst_13 : f32 to vector<16x128xf32>
    %39 = arith.maximumf %37, %38 : vector<16x128xf32>
    %40 = vector.shape_cast %39 : vector<16x128xf32> to vector<4x4x128xf32>
    %41 = arith.truncf %40 : vector<4x4x128xf32> to vector<4x4x128xbf16>
    %c0_14 = arith.constant 0 : index
    %c0_15 = arith.constant 0 : index
    %c0_16 = arith.constant 0 : index
    %c0_17 = arith.constant 0 : index
    %42 = vector.load %arg6[%c0_14, %c0_15, %c0_16, %c0_17] : memref<1x4x4x128xbf16, #tpu.memory_space<vmem>>, vector<1x4x4x128xbf16>
    %43 = vector.shape_cast %42 : vector<1x4x4x128xbf16> to vector<4x4x128xbf16>
    %44 = vector.shape_cast %41 : vector<4x4x128xbf16> to vector<1x4x4x128xbf16>
    tpu.vector_store %arg6[%c0_14, %c0_15, %c0_16, %c0_17], %44 {strides = array<i32>} : memref<1x4x4x128xbf16, #tpu.memory_space<vmem>>, vector<1x4x4x128xbf16>,
    return
  }
  func.func @transform_0(%arg0: i32, %arg1: i32) -> (i32, i32, i32, i32, i32) {
    %c0_i32 = arith.constant 0 : i32
    %c0_i32_0 = arith.constant 0 : i32
    %c0_i32_1 = arith.constant 0 : i32
    %c0_i32_2 = arith.constant 0 : i32
    return %arg0, %c0_i32, %arg1, %c0_i32_0, %c0_i32_1 : i32, i32, i32, i32, i32
  }
  func.func @transform_1(%arg0: i32, %arg1: i32) -> (i32, i32, i32, i32, i32) {
    %c1_i32 = arith.constant 1 : i32
    %0 = arith.addi %arg1, %c1_i32 : i32
    %c4_i32 = arith.constant 4 : i32
    %1 = arith.muli %0, %c4_i32 : i32
    %c0_i32 = arith.constant 0 : i32
    %c0_i32_0 = arith.constant 0 : i32
    %c0_i32_1 = arith.constant 0 : i32
    %c0_i32_2 = arith.constant 0 : i32
    return %arg0, %c0_i32, %1, %c0_i32_0, %c0_i32_1 : i32, i32, i32, i32, i32
  }
  func.func @transform_2(%arg0: i32, %arg1: i32) -> (i32, i32) {
    %c0_i32 = arith.constant 0 : i32
    %c0_i32_0 = arith.constant 0 : i32
    %c0_i32_1 = arith.constant 0 : i32
    return %c0_i32, %c0_i32_0 : i32, i32
  }
  func.func @transform_3(%arg0: i32, %arg1: i32) -> (i32, i32) {
    %c0_i32 = arith.constant 0 : i32
    %c0_i32_0 = arith.constant 0 : i32
    %c0_i32_1 = arith.constant 0 : i32
    return %c0_i32, %c0_i32_0 : i32, i32
  }
  func.func @transform_4(%arg0: i32, %arg1: i32) -> (i32, i32, i32, i32) {
    %c0_i32 = arith.constant 0 : i32
    %c0_i32_0 = arith.constant 0 : i32
    %c0_i32_1 = arith.constant 0 : i32
    return %arg0, %arg1, %c0_i32, %c0_i32_0 : i32, i32, i32, i32
  }
}

</mosaic_0001>

<bundles_post_ra>
// kernel: _forward_impl.2
= control target key start
LH: loop header
LB: loop body
LE: loop exit
PB: predicated region body
PF: predicated region fallthrough
CT: control target
= control target key end

     0   :  { %s1777_s15 = smov 0   ;;  %s1779_s16 = smov 0   ;;  %s2301_s0 = inlined_call_operand.vmem [shape: bf16[2,4,9,9,8], index: 0, kind: input, shape index: {}, may-alias: {0,1}]   ;;  %s2302_s1 = inlined_call_operand.vmem [shape: bf16[2,4,9,9,8], index: 1, kind: input, shape index: {}, may-alias: {0,1}]   ;;  %s2303_s2 = inlined_call_operand.vmem [shape: bf16[72,128], index: 2, kind: input, shape index: {}]   ;;  %s2304_s3 = inlined_call_operand.vmem [shape: f32[1,128], index: 3, kind: input, shape index: {}]   ;;  %s2305_s4 = inlined_call_operand.vmem [shape: bf16[2,8,8,128], index: 4, kind: output, shape index: {}]  }
   0x1   :  { %s1781_s17 = smov 0   ;;  %s1783_s18 = smov 0  }
   0x2   :  { %s1785_s19 = smov 0  }
   0x3 LB: > { %s26_s20 = sadd.s32 1, %s1722_s18  ;;  %p42_p1 = scmp.ne.s32.totalorder %s1714_s16, %s1710_s15  ;;  %s1726_s19 = sphi %s1785_s19, %s14_s19   ;;  %s1722_s18 = sphi %s1783_s18, %s2317_s18   ;;  %s1718_s17 = sphi %s1781_s17, %s2316_s17   ;;  %s1714_s16 = sphi %s1779_s16, %s2315_s16   ;;  %s1710_s15 = sphi %s1777_s15, %s2314_s15  }
   0x4   : > { %p28_p0 = scmp.ge.s32.totalorder %s26_s20, 2  ;;  %p43_p2 = scmp.eq.s32.totalorder %s1726_s19, 0 }
   0x5   : > { %s35_s23 = sadd.s32 1, %s1714_s16  ;;  %p1459_p5 = scmp.ge.s32.totalorder %s1726_s19, 2 }
   0x6   : > { %s2319_s20 = smov (%p28_p0, %s26_s20), 0  ;;  %p1808_p3 = por %p43_p2, %p42_p1 }
   0x7   : > { %s30_s22 = ssub.s32 %s1722_s18, %s2319_s20  ;;  %176 = sbr.rel (%p1459_p5) target bundleno = 59 (0x3b), region = 24 }
   0x8   : > { %p33_p4 = scmp.eq.s32.totalorder %s30_s22, 0 }
   0xa   : > { %s1816_s24 = scalar_select %p33_p4, %s1714_s16, %s35_s23  }
   0xc   : > { %179 = sbr.rel (!%p1808_p3) target bundleno = 50 (0x32), region = 28  ;;  %s181_s25 = sand.u32 (%p1808_p3), 1, %s1714_s16  }
   0xd   : > { %s1590_s26 = smul.u32 (%p1808_p3), 288, %s1722_s18  ;;  %s1823_s27 = sshll.u32 (%p1808_p3), %s181_s25, 8 }
   0xe   : > { %s183_s5 = scalar_lea.vmem (%p1808_p3), [#allocation2], %s1823_s27   ;;  %s1838_s8 = smov (%p1808_p3), 0  }
   0xf   : > { %s1828_s30 = scalar_lea.vmem (%p1808_p3), %s2301_s0, %s1590_s26   ;;  %s2307_s6 = smov (%p1808_p3), %s183_s5 }
  0x10   : > { %s2308_s7 = smov (%p1808_p3), %s1828_s30  ;;  %s1840_s9 = smov (%p1808_p3), 0  }
  0x11 LB: >> { %v216_v0 = vld [vmem:[%s1734_s7] sm:$0xf]  ;;  %v218_v1 = vld [vmem:[%s1734_s7 + $0x4] sm:$0xf]  ;;  %v220_v2 = vld [vmem:[%s1734_s7 + $0x8] sm:$0xf]  ;;  %s1742_s9 = sphi %s1840_s9, %s210_s9   ;;  %s1738_s8 = sphi %s1838_s8, %s2311_s8   ;;  %s1734_s7 = sphi %s2308_s7, %s2310_s7   ;;  %s1730_s6 = sphi %s2307_s6, %s2309_s6  }
  0x12   : >> { %217 = vst [vmem:[%s1730_s6] sm:$0xf] %v216_v0  ;;  %v222_v3 = vld [vmem:[%s1734_s7 + $0xc] sm:$0xf]  ;;  %v224_v4 = vld [vmem:[%s1734_s7 + $0x10] sm:$0xf]  ;;  %s280_s10 = sadd.s32 1, %s1738_s8 }
  0x13   : >> { %219 = vst [vmem:[%s1730_s6 + $0x4] sm:$0xf] %v218_v1  ;;  %v226_v5 = vld [vmem:[%s1734_s7 + $0x14] sm:$0xf]  ;;  %v228_v6 = vld [vmem:[%s1734_s7 + $0x18] sm:$0xf] }
  0x14   : >> { %221 = vst [vmem:[%s1730_s6 + $0x8] sm:$0xf] %v220_v2  ;;  %v230_v7 = vld [vmem:[%s1734_s7 + $0x1c] sm:$0xf]  ;;  %v232_v8 = vld [vmem:[%s1734_s7 + $0x48] sm:$0xf] }
  0x15   : >> { %223 = vst [vmem:[%s1730_s6 + $0xc] sm:$0xf] %v222_v3  ;;  %v234_v9 = vld [vmem:[%s1734_s7 + $0x4c] sm:$0xf]  ;;  %v236_v10 = vld [vmem:[%s1734_s7 + $0x50] sm:$0xf] }
  0x16   : >> { %225 = vst [vmem:[%s1730_s6 + $0x10] sm:$0xf] %v224_v4  ;;  %v238_v11 = vld [vmem:[%s1734_s7 + $0x54] sm:$0xf]  ;;  %v240_v12 = vld [vmem:[%s1734_s7 + $0x58] sm:$0xf] }
  0x17   : >> { %227 = vst [vmem:[%s1730_s6 + $0x14] sm:$0xf] %v226_v5  ;;  %v242_v13 = vld [vmem:[%s1734_s7 + $0x5c] sm:$0xf]  ;;  %v244_v14 = vld [vmem:[%s1734_s7 + $0x60] sm:$0xf] }
  0x18   : >> { %229 = vst [vmem:[%s1730_s6 + $0x18] sm:$0xf] %v228_v6  ;;  %v246_v15 = vld [vmem:[%s1734_s7 + $0x64] sm:$0xf]  ;;  %v248_v16 = vld [vmem:[%s1734_s7 + $0x90] sm:$0xf] }
  0x19   : >> { %231 = vst [vmem:[%s1730_s6 + $0x1c] sm:$0xf] %v230_v7  ;;  %v250_v17 = vld [vmem:[%s1734_s7 + $0x94] sm:$0xf]  ;;  %p281_p6 = scmp.ge.s32.totalorder %s280_s10, 2  ;;  %s210_s9 = sadd.s32 1, %s1742_s9  }
  0x1a   : >> { %233 = vst [vmem:[%s1730_s6 + $0x40] sm:$0xf] %v232_v8  ;;  %v252_v18 = vld [vmem:[%s1734_s7 + $0x98] sm:$0xf]  ;;  %v254_v19 = vld [vmem:[%s1734_s7 + $0x9c] sm:$0xf] }
  0x1b   : >> { %235 = vst [vmem:[%s1730_s6 + $0x44] sm:$0xf] %v234_v9  ;;  %s2321_s10 = smov (%p281_p6, %s280_s10), 0  ;;  %v256_v20 = vld [vmem:[%s1734_s7 + $0xa0] sm:$0xf]  ;;  %p209_p7 = scmp.ge.s32.totalorder %s210_s9, 2 }
  0x1c   : >> { %237 = vst [vmem:[%s1730_s6 + $0x48] sm:$0xf] %v236_v10  ;;  %v258_v21 = vld [vmem:[%s1734_s7 + $0xa4] sm:$0xf]  ;;  %s1462_s11 = sshll.u32 %s2321_s10, 5  ;;  %s2311_s8 = smov %s2321_s10 }
  0x1d   : >> { %239 = vst [vmem:[%s1730_s6 + $0x4c] sm:$0xf] %v238_v11  ;;  %v260_v22 = vld [vmem:[%s1734_s7 + $0xa8] sm:$0xf]  ;;  %s285_s12 = scalar_lea.vmem %s1828_s30, %s1462_s11   ;;  %s286_s13 = scalar_lea.vmem %s183_s5, %s1462_s11 [#allocation2]   ;;  %v262_v23 = vld [vmem:[%s1734_s7 + $0xac] sm:$0xf] }
  0x1e   : >> { %241 = vst [vmem:[%s1730_s6 + $0x50] sm:$0xf] %v240_v12  ;;  %v264_v24 = vld [vmem:[%s1734_s7 + $0xd8] sm:$0xf]  ;;  %v266_v25 = vld [vmem:[%s1734_s7 + $0xdc] sm:$0xf] }
  0x1f   : >> { %243 = vst [vmem:[%s1730_s6 + $0x54] sm:$0xf] %v242_v13  ;;  %v268_v26 = vld [vmem:[%s1734_s7 + $0xe0] sm:$0xf]  ;;  %v270_v27 = vld [vmem:[%s1734_s7 + $0xe4] sm:$0xf] }
  0x20   : >> { %245 = vst [vmem:[%s1730_s6 + $0x58] sm:$0xf] %v244_v14  ;;  %v272_v28 = vld [vmem:[%s1734_s7 + $0xe8] sm:$0xf]  ;;  %v274_v29 = vld [vmem:[%s1734_s7 + $0xec] sm:$0xf] }
  0x21   : >> { %247 = vst [vmem:[%s1730_s6 + $0x5c] sm:$0xf] %v246_v15  ;;  %v276_v30 = vld [vmem:[%s1734_s7 + $0xf0] sm:$0xf]  ;;  %v278_v31 = vld [vmem:[%s1734_s7 + $0xf4] sm:$0xf]  ;;  %s2310_s7 = smov %s285_s12 }
  0x22   : >> { %249 = vst [vmem:[%s1730_s6 + $0x80] sm:$0xf] %v248_v16 }
  0x23   : >> { %251 = vst [vmem:[%s1730_s6 + $0x84] sm:$0xf] %v250_v17 }
  0x24   : >> { %253 = vst [vmem:[%s1730_s6 + $0x88] sm:$0xf] %v252_v18 }
  0x25   : >> { %255 = vst [vmem:[%s1730_s6 + $0x8c] sm:$0xf] %v254_v19 }
  0x26   : >> { %257 = vst [vmem:[%s1730_s6 + $0x90] sm:$0xf] %v256_v20 }
  0x27   : >> { %259 = vst [vmem:[%s1730_s6 + $0x94] sm:$0xf] %v258_v21 }
  0x28   : >> { %261 = vst [vmem:[%s1730_s6 + $0x98] sm:$0xf] %v260_v22 }
  0x29   : >> { %263 = vst [vmem:[%s1730_s6 + $0x9c] sm:$0xf] %v262_v23 }
  0x2a   : >> { %265 = vst [vmem:[%s1730_s6 + $0xc0] sm:$0xf] %v264_v24 }
  0x2b   : >> { %267 = vst [vmem:[%s1730_s6 + $0xc4] sm:$0xf] %v266_v25 }
  0x2c   : >> { %269 = vst [vmem:[%s1730_s6 + $0xc8] sm:$0xf] %v268_v26 }
  0x2d   : >> { %271 = vst [vmem:[%s1730_s6 + $0xcc] sm:$0xf] %v270_v27  ;;  %212 = sbr.rel (!%p209_p7) target bundleno = 17 (0x11), region = 196 }
  0x2e   : >> { %273 = vst [vmem:[%s1730_s6 + $0xd0] sm:$0xf] %v272_v28 }
  0x2f   : >> { %275 = vst [vmem:[%s1730_s6 + $0xd4] sm:$0xf] %v274_v29 }
  0x30   : >> { %277 = vst [vmem:[%s1730_s6 + $0xd8] sm:$0xf] %v276_v30 }
  0x31   : >> { %279 = vst [vmem:[%s1730_s6 + $0xdc] sm:$0xf] %v278_v31  ;;  %s2309_s6 = smov %s286_s13 }
  0x32 PF: > { %477 = sbr.rel (!%p1808_p3) target bundleno = 59 (0x3b), region = 90  ;;  %s479_s14 = sand.u32 (%p1808_p3), 1, %s1714_s16  }
  0x33   : > { %s1471_s22 = smul.u32 (%p1808_p3), 288, %s1722_s18  ;;  %s1470_s23 = sshll.u32 (%p1808_p3), %s479_s14, 5 }
  0x34   : > { %s481_s29 = scalar_lea.vmem (%p1808_p3), [#allocation3], %s1470_s23 }
  0x35   : > { %s1363_s28 = scalar_lea.vmem (%p1808_p3), %s2302_s1, %s1471_s22 }
  0x36   : > { %v1472_v32 = vld [vmem:[%s1363_s28 + $0x40] sm:$0xff] (%p1808_p3)   ;;  %v1474_v33 = vld [vmem:[%s1363_s28 + $0x88] sm:$0xff] (%p1808_p3)   ;;  %v1476_v34 = vld [vmem:[%s1363_s28 + $0xd0] sm:$0xff] (%p1808_p3)  }
  0x37   : > { %506 = vst [vmem:[%s481_s29] sm:$0xff] %v1472_v32   ;;  %v1478_v35 = vld [vmem:[%s1363_s28 + $0x118] sm:$0xff]  }
  0x38   : > { %510 = vst [vmem:[%s481_s29 + $0x8] sm:$0xff] %v1474_v33  }
  0x39   : > { %514 = vst [vmem:[%s481_s29 + $0x10] sm:$0xff] %v1476_v34  }
  0x3a   : > { %518 = vst [vmem:[%s481_s29 + $0x18] sm:$0xff] %v1478_v35  }
  0x3b PF: > { %p1480_p8 = scmp.ge.s32.totalorder %s1726_s19, 1  ;;  %p559_p9 = scmp.lt.s32.totalorder %s1726_s19, 3 }
  0x3d   : > { %p560_p10 = pnand %p1480_p8, %p559_p9 }
  0x3e   : > { %s566_s21 = sand.u32 (!%p560_p10), 1, %s1710_s15   ;;  %s1744_s5 = smov (!%p560_p10), 32  }
  0x3f   : > { %563 = sbr.rel (%p560_p10) target bundleno = 414 (0x19e), region = 131  ;;  %s1481_s27 = sshll.u32 (!%p560_p10), %s566_s21, 8 }
  0x40   : > { %s1947_s30 = scalar_lea.vmem (!%p560_p10), [#allocation2], %s1481_s27  ;;  %s1745_s6 = smov (!%p560_p10), 8  }
  0x41   : > { %s1746_s7 = smov (!%p560_p10), 24   ;;  %s1747_s8 = smov (!%p560_p10), 16  }
  0x42   : > { %s2069_s9 = sshll.u32 (!%p560_p10), %s566_s21, 5  ;;  %s1748_s10 = smov (!%p560_p10), 40  }
  0x43   : > { %s575_s15 = scalar_lea.vmem (!%p560_p10), [#allocation3], %s2069_s9  ;;  %s1749_s11 = smov (!%p560_p10), 48  }
  0x44   : > { %vm676_vm0 = vsmask.f32 3328  ;;  %v1950_v36 = vld [vmem:[%s1947_s30 + $0x60] sm:$0xf]  ;;  %v1953_v37 = vld [vmem:[%s1947_s30 + $0x68] sm:$0xf] }
  0x45   : > { %v1515_v38 = vld [vmem:[%s1947_s30 + $0xf0] sm:$0xf]  ;;  %v949_v39 = vunpack.c.l.b16 %v1950_v36  ;;  %v950_v40 = vunpack.c.l.b16 %v1953_v37  ;;  %v1547_v41 = vld [vmem:[%s1947_s30 + $0xf4] sm:$0xf0]  ;;  %v1968_v47 = vld [vmem:[%s1947_s30 + $0x20] sm:$0xf] }
  0x46   : > { %v1960_v42 = vld [vmem:[%s1947_s30 + $0x70] sm:$0xf]  ;;  %v1963_v43 = vld [vmem:[%s1947_s30 + $0x78] sm:$0xf]  ;;  %v1516_v44 = vor.u32 %v1547_v41, %v1515_v38  ;;  %v634_v48 = vld [vmem:[%s1947_s30 + $0x24] sm:$0x1] }
  0x47   : > { %v951_v45 = vunpack.c.l.b16 %v1960_v42  ;;  %v952_v46 = vunpack.c.l.b16 %v1963_v43  ;;  %v1972_v49 = vld [vmem:[%s1947_s30 + $0x28] sm:$0xf]  ;;  %v955_v50 = vpack.c.b16 %v950_v40, %v949_v39  ;;  %v636_v51 = vld [vmem:[%s1947_s30 + $0x2c] sm:$0x1]  ;;  %v736_v52 = vshrl.u32 %v1968_v47, 16  ;;  %s1750_s12 = smov 56  }
  0x48   : > { %v739_v53 = vshll.u32 %v1968_v47, 16  ;;  %v745_v54 = vshll.u32 %v634_v48, 16  ;;  %1039 = vrot.lane.b32.xlu1 %v1516_v44, %s1744_s5  ;;  %v750_v55 = vshrl.u32 %v1972_v49, 16  ;;  %v753_v56 = vshll.u32 %v1972_v49, 16  ;;  %v1985_v58 = vld [vmem:[%s1947_s30 + $0xe0] sm:$0xf] }
  0x49   : > { %v759_v57 = vshll.u32 %v636_v51, 16  ;;  %961 = vrot.lane.b32.xlu0 %v955_v50, %s1745_s6  ;;  %vm677_vm1 = vsmask.f32 7440  ;;  %v738_v59 = vrot.slane %v736_v52, 4  ;;  %v1989_v61 = vld [vmem:[%s1947_s30 + $0xe4] sm:$0xf0]  ;;  %v956_v3 = vpack.c.b16 %v952_v46, %v951_v45 }
  0x4a   : > { %v741_v60 = vrot.slane %v739_v53, 5  ;;  %v747_v62 = vrot.slane %v745_v54, 5  ;;  %v752_v63 = vrot.slane %v750_v55, 4  ;;  %v755_v0 = vrot.slane %v753_v56, 5  ;;  %v1992_v2 = vld [vmem:[%s1947_s30 + $0x30] sm:$0xf]  ;;  %vm2007_vm2 = vmor %vm676_vm0, %vm677_vm1 }
  0x4b   : > { %v761_v1 = vrot.slane %v759_v57, 5  ;;  %v1512_v5 = vor.u32 %v1989_v61, %v1985_v58  ;;  %v638_v6 = vld [vmem:[%s1947_s30 + $0x34] sm:$0x1]  ;;  %v2002_v7 = vld [vmem:[%s1947_s30 + $0x38] sm:$0xf]  ;;  %v764_v11 = vshrl.u32 %v1992_v2, 16 }
  0x4c   : > { %v742_v4 = vor.u32 %v741_v60, %v738_v59  ;;  %v640_v8 = vld [vmem:[%s1947_s30 + $0x3c] sm:$0x1]  ;;  %v756_v10 = vor.u32 %v755_v0, %v752_v63  ;;  %v767_v12 = vshll.u32 %v1992_v2, 16  ;;  %v773_v13 = vshll.u32 %v638_v6, 16  ;;  %v1495_v14 = vld [vmem:[%s1947_s30 + $0xa0] sm:$0xf] }
  0x4d   : > { %v778_v16 = vshrl.u32 %v2002_v7, 16  ;;  %v781_v17 = vshll.u32 %v2002_v7, 16  ;;  %v787_v18 = vshll.u32 %v640_v8, 16  ;;  %v1542_v19 = vld [vmem:[%s1947_s30 + $0xa4] sm:$0xf0]  ;;  %v766_v21 = vrot.slane %v764_v11, 4 }
  0x4e   : > { %v743_v15 = vrot.slane %v742_v4, 4  ;;  %v757_v20 = vrot.slane %v756_v10, 4  ;;  %v769_v22 = vrot.slane %v767_v12, 5  ;;  %v775_v23 = vrot.slane %v773_v13, 5  ;;  %v661_v24 = vld [vmem:[%s1947_s30 + $0xb0] sm:$0xf] }
  0x4f   : > { %v780_v26 = vrot.slane %v778_v16, 4  ;;  %v783_v27 = vrot.slane %v781_v17, 5  ;;  %v789_v28 = vrot.slane %v787_v18, 5  ;;  %v662_v29 = vld [vmem:[%s1947_s30 + $0xb4] sm:$0x1]  ;;  %v1496_v33 = vor.u32 %v1542_v19, %v1495_v14  ;;  %s1751_s13 = smov 64  }
  0x50   : > { %v748_v25 = vsel %vm2007_vm2, %v743_v15, %v747_v62  ;;  %v762_v30 = vsel %vm2007_vm2, %v757_v20, %v761_v1  ;;  %v770_v32 = vor.u32 %v769_v22, %v766_v21  ;;  %v663_v34 = vld [vmem:[%s1947_s30 + $0xb8] sm:$0xf]  ;;  %v664_v41 = vld [vmem:[%s1947_s30 + $0xbc] sm:$0x1]  ;;  %v876_v44 = vshrl.u32 %v661_v24, 16  ;;  %p615_p11 = scmp.lt.s32.totalorder %s1718_s17, 1 }
  0x51   : > { %v2023_v31 = vunpack.c.l.b16 %v748_v25  ;;  %963 = vrot.lane.b32.xlu0 %v956_v3, %s1745_s6  ;;  %v2027_v35 = vunpack.c.l.b16 %v762_v30  ;;  %v784_v38 = vor.u32 %v783_v27, %v780_v26  ;;  %v879_v48 = vshll.u32 %v661_v24, 16  ;;  %1009 = vrot.lane.b32.xlu2 %v1496_v33, %s1746_s7  ;;  %v1499_v54 = vld [vmem:[%s1947_s30 + $0xb0] sm:$0xf]  ;;  %v1543_v60 = vld [vmem:[%s1947_s30 + $0xb4] sm:$0xf0] }
  0x52   : > { %v771_v50 = vrot.slane %v770_v32, 4  ;;  %v885_v51 = vshll.u32 %v662_v29, 16  ;;  %v890_v52 = vshrl.u32 %v663_v34, 16  ;;  %v893_v53 = vshll.u32 %v663_v34, 16  ;;  %v657_v13 = vld [vmem:[%s1947_s30 + $0xa0] sm:$0xf] }
  0x53   : > { %v975_v55 = vpack.c.b16 %v2027_v35, %v2023_v31  ;;  %v785_v56 = vrot.slane %v784_v38, 4  ;;  %v878_v57 = vrot.slane %v876_v44, 4  ;;  %v881_v59 = vrot.slane %v879_v48, 5  ;;  %v658_v16 = vld [vmem:[%s1947_s30 + $0xa4] sm:$0x1]  ;;  %v1551_v36 = vld [vmem:[%s2303_s2 + $0x18] sm:$0xff] }
  0x54   : > { %v776_v62 = vsel %vm2007_vm2, %v771_v50, %v775_v23  ;;  %v887_v63 = vrot.slane %v885_v51, 5  ;;  %v892_v0 = vrot.slane %v890_v52, 4  ;;  %v895_v1 = vrot.slane %v893_v53, 5  ;;  %v659_v20 = vld [vmem:[%s1947_s30 + $0xa8] sm:$0xf]  ;;  %s2323_s17 = smov (!%p615_p11, %s1718_s17), 1 }
  0x55   : > { %981 = vrot.lane.b32.xlu1 %v975_v55, %s1747_s8  ;;  %v790_v3 = vsel %vm2007_vm2, %v785_v56, %v789_v28  ;;  %v2040_v4 = vunpack.c.l.b16 %v776_v62  ;;  %v882_v6 = vor.u32 %v881_v59, %v878_v57  ;;  %v899_v8 = vshll.u32 %v664_v41, 16  ;;  %v2058_v23 = vld [vmem:[%s1947_s30 + $0x40] sm:$0xf]  ;;  %v660_v24 = vld [vmem:[%s1947_s30 + $0xac] sm:$0x1] }
  0x56   : > { %v2042_v10 = vunpack.c.l.b16 %v790_v3  ;;  %v896_v11 = vor.u32 %v895_v1, %v892_v0  ;;  %v1500_v12 = vor.u32 %v1543_v60, %v1499_v54  ;;  %v930_v18 = vunpack.c.l.b16 %v1972_v49  ;;  %v2065_v58 = vld [vmem:[%s1947_s30 + $0x48] sm:$0xf]  ;;  %v2072_v33 = vld [vmem:[%s1947_s30] sm:$0xf]  ;;  %v626_v48 = vld [vmem:[%s1947_s30 + $0x4] sm:$0x1] }
  0x57   : > { %v883_v14 = vrot.slane %v882_v6, 4  ;;  %v901_v15 = vrot.slane %v899_v8, 5  ;;  %v931_v19 = vunpack.c.l.b16 %v1992_v2  ;;  %v848_v25 = vshrl.u32 %v657_v13, 16  ;;  %v2081_v50 = vld [vmem:[%s1947_s30 + $0x8] sm:$0xf] }
  0x58   : > { %v897_v17 = vrot.slane %v896_v11, 4  ;;  %v976_v21 = vpack.c.b16 %v2042_v10, %v2040_v4  ;;  %v851_v26 = vshll.u32 %v657_v13, 16  ;;  %v857_v61 = vshll.u32 %v658_v16, 16  ;;  %v2085_v52 = vld [vmem:[%s1947_s30 + $0x50] sm:$0xf] }
  0x59   : > { %1037 = vrot.lane.b32.xlu0 %v1512_v5, %s1744_s5  ;;  %v888_v22 = vsel %vm2007_vm2, %v883_v14, %v887_v63  ;;  %1011 = vrot.lane.b32.xlu2 %v1500_v12, %s1746_s7  ;;  %v850_v29 = vrot.slane %v848_v25, 4  ;;  %v862_v32 = vshrl.u32 %v659_v20, 16  ;;  %v1065_v34 = vpack.c.b16 %v931_v19, %v930_v18  ;;  %v628_v59 = vld [vmem:[%s1947_s30 + $0xc] sm:$0x1]  ;;  %v2092_v63 = vld [vmem:[%s1947_s30 + $0x58] sm:$0xf] }
  0x5a   : > { %v902_v27 = vsel %vm2007_vm2, %v897_v17, %v901_v15  ;;  %v1047_v28 = vunpack.c.l.b16 %v888_v22  ;;  %v853_v30 = vrot.slane %v851_v26, 5  ;;  %v945_v38 = vunpack.c.l.b16 %v2058_v23  ;;  %v673_v14 = vld [vmem:[%s575_s15] sm:$0xf]  ;;  %v675_v26 = vld [vmem:[%s575_s15 + $0x8] sm:$0xf] }
  0x5b   : > { %v1048_v5 = vunpack.c.l.b16 %v902_v27  ;;  %v865_v41 = vshll.u32 %v659_v20, 16  ;;  %v871_v44 = vshll.u32 %v660_v24, 16  ;;  %v859_v54 = vrot.slane %v857_v61, 5  ;;  %v1545_v9 = vld [vmem:[%s1947_s30 + $0xd4] sm:$0xf0] }
  0x5c   : > { %v854_v53 = vor.u32 %v853_v30, %v850_v29  ;;  %v864_v55 = vrot.slane %v862_v32, 4  ;;  %v946_v56 = vunpack.c.l.b16 %v2065_v58  ;;  %v680_v60 = vshrl.u32 %v2072_v33, 16  ;;  %v674_v29 = vld [vmem:[%s575_s15 + $0x4] sm:$0x1] }
  0x5d   : > { %983 = vrot.lane.b32.xlu1 %v976_v21, %s1747_s8  ;;  %v1052_v51 = vpack.c.b16 %v1048_v5, %v1047_v28  ;;  %v867_v57 = vrot.slane %v865_v41, 5  ;;  %v683_v62 = vshll.u32 %v2072_v33, 16  ;;  %v873_v1 = vrot.slane %v871_v44, 5 }
  0x5e   : > { %v855_v0 = vrot.slane %v854_v53, 4  ;;  %v689_v3 = vshll.u32 %v626_v48, 16  ;;  %v694_v6 = vshrl.u32 %v2081_v50, 16  ;;  %v682_v11 = vrot.slane %v680_v60, 4 }
  0x5f   : > { %v868_v8 = vor.u32 %v867_v57, %v864_v55  ;;  %v685_v12 = vrot.slane %v683_v62, 5  ;;  %v697_v13 = vshll.u32 %v2081_v50, 16  ;;  %v947_v15 = vunpack.c.l.b16 %v2085_v52  ;;  %v2111_v62 = vld [vmem:[%s1947_s30 + $0x18] sm:$0xf] }
  0x60   : > { %v860_v16 = vsel %vm2007_vm2, %v855_v0, %v859_v54  ;;  %v696_v17 = vrot.slane %v694_v6, 4  ;;  %v703_v20 = vshll.u32 %v628_v59, 16  ;;  %v948_v21 = vunpack.c.l.b16 %v2092_v63  ;;  %v2108_v54 = vld [vmem:[%s1947_s30 + $0x10] sm:$0xf] }
  0x61   : > { %1059 = vrot.lane.b32.xlu0 %v1052_v51, %s1748_s10  ;;  %v869_v22 = vrot.slane %v868_v8, 4  ;;  %v686_v23 = vor.u32 %v685_v12, %v682_v11  ;;  %v699_v24 = vrot.slane %v697_v13, 5  ;;  %v1045_v25 = vunpack.c.l.b16 %v860_v16  ;;  %v630_v11 = vld [vmem:[%s1947_s30 + $0x14] sm:$0x1] }
  0x62   : > { %v691_v27 = vrot.slane %v689_v3, 5  ;;  %v904_v28 = vshrl.u32 %v673_v14, 16  ;;  %v907_v61 = vshll.u32 %v673_v14, 16  ;;  %v705_v41 = vrot.slane %v703_v20, 5 }
  0x63   : > { %v874_v5 = vsel %vm2007_vm2, %v869_v22, %v873_v1  ;;  %v687_v30 = vrot.slane %v686_v23, 4  ;;  %v700_v32 = vor.u32 %v699_v24, %v696_v17  ;;  %v953_v44 = vpack.c.b16 %v946_v56, %v945_v38  ;;  %v649_v22 = vld [vmem:[%s1947_s30 + $0x80] sm:$0xf] }
  0x64   : > { %v1046_v48 = vunpack.c.l.b16 %v874_v5  ;;  %v906_v51 = vrot.slane %v904_v28, 4  ;;  %v909_v53 = vrot.slane %v907_v61, 5  ;;  %v1076_v55 = vunpack.c.l.b16 %v675_v26  ;;  %v632_v26 = vld [vmem:[%s1947_s30 + $0x1c] sm:$0x1] }
  0x65   : > { %1071 = vrot.lane.b32.xlu1 %v1065_v34, %s1749_s11  ;;  %v701_v57 = vrot.slane %v700_v32, 4  ;;  %v913_v60 = vshll.u32 %v674_v29, 16  ;;  %v692_v0 = vsel %vm2007_vm2, %v687_v30, %v691_v27  ;;  %v708_v1 = vshrl.u32 %v2108_v54, 16 }
  0x66   : > { %v1051_v59 = vpack.c.b16 %v1046_v48, %v1045_v25  ;;  %v910_v38 = vor.u32 %v909_v53, %v906_v51  ;;  %v954_v3 = vpack.c.b16 %v948_v21, %v947_v15  ;;  %v932_v6 = vunpack.c.l.b16 %v2002_v7  ;;  %v653_v53 = vld [vmem:[%s1947_s30 + $0x90] sm:$0xf] }
  0x67   : > { %v706_v34 = vsel %vm2007_vm2, %v701_v57, %v705_v41  ;;  %v1062_v8 = vunpack.c.l.b16 %v673_v14  ;;  %v711_v12 = vshll.u32 %v2108_v54, 16  ;;  %v1080_v13 = vpack.c.b16 %v1076_v55, %v952_v46  ;;  %v651_v14 = vld [vmem:[%s1947_s30 + $0x88] sm:$0xf] }
  0x68   : > { %1057 = vrot.lane.b32.xlu2 %v1051_v59, %s1748_s10  ;;  %v710_v16 = vrot.slane %v708_v1, 4  ;;  %v722_v17 = vshrl.u32 %v2111_v62, 16  ;;  %v725_v20 = vshll.u32 %v2111_v62, 16  ;;  %v965_v23 = vunpack.c.l.b16 %v692_v0  ;;  %v650_v0 = vld [vmem:[%s1947_s30 + $0x84] sm:$0x1] }
  0x69   : > { %957 = vrot.lane.b32.xlu0 %v953_v44, %s1745_s6  ;;  %v2132_v24 = vunpack.c.l.b16 %v706_v34  ;;  %v915_v25 = vrot.slane %v913_v60, 5  ;;  %v713_v27 = vrot.slane %v711_v12, 5  ;;  %v911_v28 = vrot.slane %v910_v38, 4 }
  0x6a   : > { %v717_v61 = vshll.u32 %v630_v11, 16  ;;  %v724_v5 = vrot.slane %v722_v17, 4  ;;  %v727_v43 = vrot.slane %v725_v20, 5  ;;  %v1066_v46 = vpack.c.b16 %v1062_v8, %v932_v6  ;;  %v655_v8 = vld [vmem:[%s1947_s30 + $0x98] sm:$0xf] }
  0x6b   : > { %v714_v29 = vor.u32 %v713_v27, %v710_v16  ;;  %v792_v30 = vshrl.u32 %v649_v22, 16  ;;  %v795_v32 = vshll.u32 %v649_v22, 16  ;;  %v731_v44 = vshll.u32 %v632_v26, 16  ;;  %v652_v16 = vld [vmem:[%s1947_s30 + $0x8c] sm:$0x1] }
  0x6c   : > { %v728_v41 = vor.u32 %v727_v43, %v724_v5  ;;  %v806_v48 = vshrl.u32 %v651_v14, 16  ;;  %v809_v51 = vshll.u32 %v651_v14, 16  ;;  %v973_v55 = vpack.c.b16 %v2132_v24, %v965_v23 }
  0x6d   : > { %959 = vrot.lane.b32.xlu1 %v954_v3, %s1745_s6  ;;  %v916_v57 = vsel %vm2007_vm2, %v911_v28, %v915_v25  ;;  %v715_v59 = vrot.slane %v714_v29, 4  ;;  %v719_v60 = vrot.slane %v717_v61, 5  ;;  %v794_v34 = vrot.slane %v792_v30, 4 }
  0x6e   : > { %v797_v38 = vrot.slane %v795_v32, 5  ;;  %v808_v1 = vrot.slane %v806_v48, 4  ;;  %v811_v3 = vrot.slane %v809_v51, 5  ;;  %v729_v11 = vrot.slane %v728_v41, 4  ;;  %v1491_v51 = vld [vmem:[%s1947_s30 + $0x90] sm:$0xf] }
  0x6f   : > { %v733_v12 = vrot.slane %v731_v44, 5  ;;  %v820_v17 = vshrl.u32 %v653_v53, 16  ;;  %v823_v20 = vshll.u32 %v653_v53, 16  ;;  %v1092_v22 = vpack.c.b16 %v2040_v4, %v2027_v35  ;;  %v656_v4 = vld [vmem:[%s1947_s30 + $0x9c] sm:$0x1] }
  0x70   : > { %1073 = vrot.lane.b32.xlu2 %v1066_v46, %s1749_s11  ;;  %v1089_v23 = vunpack.c.l.b16 %v916_v57  ;;  %v801_v25 = vshll.u32 %v650_v0, 16  ;;  %v834_v26 = vshrl.u32 %v655_v8, 16  ;;  %v837_v27 = vshll.u32 %v655_v8, 16  ;;  %v1541_v53 = vld [vmem:[%s1947_s30 + $0x94] sm:$0xf0] }
  0x71   : > { %1087 = vrot.lane.b32.xlu0 %v1080_v13, %s1750_s12  ;;  %v1079_v13 = vpack.c.b16 %v951_v45, %v950_v40  ;;  %v720_v14 = vsel %vm2007_vm2, %v715_v59, %v719_v60  ;;  %v798_v28 = vor.u32 %v797_v38, %v794_v34  ;;  %v812_v61 = vor.u32 %v811_v3, %v808_v1  ;;  %v654_v45 = vld [vmem:[%s1947_s30 + $0x94] sm:$0x1]  ;;  %v1503_v0 = vld [vmem:[%s1947_s30 + $0xc0] sm:$0xf]  ;;  %v1544_v3 = vld [vmem:[%s1947_s30 + $0xc4] sm:$0xf0] }
  0x72   : > { %v815_v5 = vshll.u32 %v652_v16, 16  ;;  %v734_v35 = vsel %vm2007_vm2, %v729_v11, %v733_v12  ;;  %v822_v37 = vrot.slane %v820_v17, 4  ;;  %v825_v42 = vrot.slane %v823_v20, 5 }
  0x73   : > { %v836_v40 = vrot.slane %v834_v26, 4  ;;  %v839_v43 = vrot.slane %v837_v27, 5  ;;  %v1093_v46 = vpack.c.b16 %v1089_v23, %v2042_v10  ;;  %v967_v29 = vunpack.c.l.b16 %v720_v14  ;;  %v1540_v26 = vld [vmem:[%s1947_s30 + $0x84] sm:$0xf0] }
  0x74   : > { %v803_v30 = vrot.slane %v801_v25, 5  ;;  %v968_v32 = vunpack.c.l.b16 %v734_v35  ;;  %v799_v41 = vrot.slane %v798_v28, 4  ;;  %v813_v44 = vrot.slane %v812_v61, 4  ;;  %v1487_v25 = vld [vmem:[%s1947_s30 + $0x80] sm:$0xf] }
  0x75   : > { %977 = vrot.lane.b32.xlu1 %v973_v55, %s1747_s8  ;;  %v817_v48 = vrot.slane %v815_v5, 5  ;;  %v826_v55 = vor.u32 %v825_v42, %v822_v37  ;;  %v829_v57 = vshll.u32 %v654_v45, 16  ;;  %v840_v59 = vor.u32 %v839_v43, %v836_v40  ;;  %v1507_v42 = vld [vmem:[%s1947_s30 + $0xd0] sm:$0xf] }
  0x76   : > { %v843_v60 = vshll.u32 %v656_v4, 16  ;;  %v1492_v10 = vor.u32 %v1541_v53, %v1491_v51  ;;  %v974_v34 = vpack.c.b16 %v968_v32, %v967_v29  ;;  %v804_v38 = vsel %vm2007_vm2, %v799_v41, %v803_v30  ;;  %v1548_v53 = vld [vmem:[%s2303_s2] sm:$0xff] }
  0x77   : > { %v818_v1 = vsel %vm2007_vm2, %v813_v44, %v817_v48  ;;  %v827_v8 = vrot.slane %v826_v55, 4  ;;  %v831_v11 = vrot.slane %v829_v57, 5  ;;  %v841_v12 = vrot.slane %v840_v59, 4  ;;  %v1549_v48 = vld [vmem:[%s2303_s2 + $0x8] sm:$0xff] }
  0x78   : > { %1085 = vrot.lane.b32.xlu2 %v1079_v13, %s1750_s12  ;;  %v845_v16 = vrot.slane %v843_v60, 5  ;;  %v1504_v17 = vor.u32 %v1544_v3, %v1503_v0  ;;  %v1041_v20 = vunpack.c.l.b16 %v804_v38  ;;  %v1488_v61 = vor.u32 %v1540_v26, %v1487_v25 }
  0x79   : > { %1098 = vrot.lane.b32.xlu0 %v1092_v22, %s1751_s13  ;;  %v1042_v22 = vunpack.c.l.b16 %v818_v1  ;;  %v832_v13 = vsel %vm2007_vm2, %v827_v8, %v831_v11  ;;  %v928_v35 = vunpack.c.l.b16 %v2111_v62  ;;  %v929_v37 = vunpack.c.l.b16 %v1968_v47 }
  0x7a   : > { %v846_v23 = vsel %vm2007_vm2, %v841_v12, %v845_v16  ;;  %v1043_v14 = vunpack.c.l.b16 %v832_v13  ;;  %v1508_v45 = vor.u32 %v1545_v9, %v1507_v42  ;;  %v1077_v4 = vpack.c.b16 %v947_v15, %v946_v56  ;;  %v1186_v15 = vld [vmem:[%s2303_s2 + $0x20] sm:$0xf] }
  0x7b   : > { %v1049_v27 = vpack.c.b16 %v1042_v22, %v1041_v20  ;;  %v1044_v28 = vunpack.c.l.b16 %v846_v23  ;;  %v1064_v40 = vpack.c.b16 %v929_v37, %v928_v35  ;;  %v926_v43 = vunpack.c.l.b16 %v2081_v50 }
  0x7c   : > { %v927_v47 = vunpack.c.l.b16 %v2108_v54  ;;  %v1091_v58 = vpack.c.b16 %v2023_v31, %v968_v32  ;;  %v1078_v52 = vpack.c.b16 %v949_v39, %v948_v21  ;;  %vm1227_vm3 = vcmask 1043456   ;;  %v1550_v39 = vld [vmem:[%s2303_s2 + $0x10] sm:$0xff] }
  0x7d   : > { %1100 = vrot.lane.b32.xlu1 %v1093_v46, %s1751_s13  ;;  %v1050_v5 = vpack.c.b16 %v1044_v28, %v1043_v14  ;;  %v1090_v46 = vpack.c.b16 %v967_v29, %v2132_v24  ;;  %v1208_v24 = vunpack.c.l.b16 %v1186_v15  ;;  %v935_v0 = vpack.c.b16 %v930_v18, %v929_v37 }
  0x7e   : > { %v1063_v30 = vpack.c.b16 %v927_v47, %v926_v43  ;;  %vm1102_vm4 = vcmask 64512   ;;  %vm1115_vm5 = vcmask 130048   ;;  %v936_v3 = vpack.c.b16 %v932_v6, %v931_v19 }
  0x7f   : > { %v1213_v29 = vpack.c.b16 %v1208_v24, %v1208_v24  ;;  %vm1124_vm6 = vcmask 195584   ;;  %vm1133_vm7 = vcmask 261120   ;;  %vm1142_vm8 = vcmask 326656  }
  0x80   : > { %979 = vrot.lane.b32.xlu2 %v974_v34, %s1747_s8  ;;  %vm1151_vm9 = vcmask 392192   ;;  %vm1160_vm10 = vcmask 457728   ;;  %vm1169_vm11 = vcmask 523264   ;;  %vm1218_vm12 = vcmask 588800  }
  0x81   : > { %1007 = vrot.lane.b32.xlu0 %v1492_v10, %s1746_s7  ;;  %v1229_v32 = vsel %vm1227_vm3, %v1213_v29, 0 }
  0x82   : > { %1576 = vmatpush.bf16.msra.mxu2 %v1229_v32  ;;  %1577 = vmatpush.bf16.msra.mxu3 %v1229_v32 }
  0x83   : > { %1234 = vmatpush.bf16.msra.mxu0 %v1229_v32  ;;  %1575 = vmatpush.bf16.msra.mxu1 %v1229_v32 }
  0x85   : > { %1033 = vrot.lane.b32.xlu1 %v1504_v17, %s1744_s5 }
  0x86   : > { %1579 = vmatpush.bf16.msra.mxu2 %v1551_v36  ;;  %1580 = vmatpush.bf16.msra.mxu3 %v1551_v36 }
  0x87   : > { %1235 = vmatpush.bf16.msra.mxu0 %v1551_v36  ;;  %1578 = vmatpush.bf16.msra.mxu1 %v1551_v36 }
  0x88   : > { %1005 = vrot.lane.b32.xlu2 %v1488_v61, %s1746_s7  ;;  %s1539_s7 = sshll.u32 %s2323_s17, 5 }
  0x89   : > { %1053 = vrot.lane.b32.xlu0 %v1049_v27, %s1748_s10  ;;  %s622_s15 = scalar_lea.vmem %s2305_s4, %s1539_s7 }
  0x8a   : > { %1582 = vmatpush.bf16.msra.mxu2 %v1550_v39  ;;  %1583 = vmatpush.bf16.msra.mxu3 %v1550_v39 }
  0x8b   : > { %1236 = vmatpush.bf16.msra.mxu0 %v1550_v39  ;;  %1581 = vmatpush.bf16.msra.mxu1 %v1550_v39 }
  0x8d   : > { %1055 = vrot.lane.b32.xlu1 %v1050_v5, %s1748_s10 }
  0x8e   : > { %1585 = vmatpush.bf16.msra.mxu2 %v1549_v48  ;;  %1586 = vmatpush.bf16.msra.mxu3 %v1549_v48 }
  0x8f   : > { %1237 = vmatpush.bf16.msra.mxu0 %v1549_v48  ;;  %1584 = vmatpush.bf16.msra.mxu1 %v1549_v48 }
  0x90   : > { %1035 = vrot.lane.b32.xlu2 %v1508_v45, %s1744_s5 }
  0x91   : > { %1069 = vrot.lane.b32.xlu0 %v1064_v40, %s1749_s11  ;;  %v925_v40 = vunpack.c.l.b16 %v2072_v33 }
  0x92   : > { %1588 = vmatpush.bf16.msra.mxu2 %v1548_v53  ;;  %1589 = vmatpush.bf16.msra.mxu3 %v1548_v53 }
  0x93   : > { %1238 = vmatpush.bf16.msra.mxu0 %v1548_v53  ;;  %1587 = vmatpush.bf16.msra.mxu1 %v1548_v53  ;;  %v1671_v53 = vld [vmem:[%s2304_s3] ss:$0 sm:$0xff] }
  0x95   : > { %1081 = vrot.lane.b32.xlu1 %v1077_v4, %s1750_s12  ;;  %v933_v4 = vpack.c.b16 %v926_v43, %v925_v40 }
  0x98   : > { %1067 = vrot.lane.b32.xlu2 %v1063_v30, %s1749_s11 }
  0x99   : > { %1094 = vrot.lane.b32.xlu0 %v1090_v46, %s1751_s13  ;;  %v934_v46 = vpack.c.b16 %v928_v35, %v927_v47 }
  0x9d   : > { %1096 = vrot.lane.b32.xlu1 %v1091_v58, %s1751_s13 }
  0xa0   : > { %1083 = vrot.lane.b32.xlu2 %v1078_v52, %s1750_s12 }
  0xab   : > { %v1010_v56 = vpop.permute.xlu2 %1009 }
  0xb3   : > { %v1012_v44 = vpop.permute.xlu2 %1011 }
  0xba   : > { %v1040_v41 = vpop.permute.xlu1 %1039 }
  0xbb   : > { %v962_v31 = vpop.permute.xlu0 %961 }
  0xbc   : > { %v1111_v1 = vsel %vm1102_vm4, %v935_v0, %v962_v31 }
  0xc2   : > { %v1058_v51 = vpop.permute.xlu2 %1057 }
  0xc3   : > { %v964_v63 = vpop.permute.xlu0 %963 }
  0xc4   : > { %v1114_v12 = vsel %vm1102_vm4, %v936_v3, %v964_v63 }
  0xc7   : > { %v982_v21 = vpop.permute.xlu1 %981 }
  0xc8   : > { %v1121_v11 = vsel %vm1115_vm5, %v1111_v1, %v982_v21 }
  0xc9   : > { %v1130_v49 = vsel %vm1124_vm6, %v1121_v11, %v1010_v56 }
  0xca   : > { %v1074_v59 = vpop.permute.xlu2 %1073 }
  0xcb   : > { %v1038_v55 = vpop.permute.xlu0 %1037 }
  0xcc   : > { %v1139_v16 = vsel %vm1133_vm7, %v1130_v49, %v1038_v55 }
  0xcd   : > { %v1148_v19 = vsel %vm1142_vm8, %v1139_v16, %v1058_v51 }
  0xcf   : > { %v984_v57 = vpop.permute.xlu1 %983 }
  0xd0   : > { %v1123_v17 = vsel %vm1115_vm5, %v1114_v12, %v984_v57 }
  0xd1   : > { %v1132_v7 = vsel %vm1124_vm6, %v1123_v17, %v1012_v44 }
  0xd2   : > { %v1086_v38 = vpop.permute.xlu2 %1085  ;;  %v1141_v22 = vsel %vm1133_vm7, %v1132_v7, %v1040_v41 }
  0xd3   : > { %v1060_v60 = vpop.permute.xlu0 %1059 }
  0xd4   : > { %v1150_v13 = vsel %vm1142_vm8, %v1141_v22, %v1060_v60 }
  0xd5   : > { %v1159_v27 = vsel %vm1151_vm9, %v1150_v13, %v1074_v59 }
  0xd7   : > { %v1072_v10 = vpop.permute.xlu1 %1071 }
  0xd8   : > { %v1157_v20 = vsel %vm1151_vm9, %v1148_v19, %v1072_v10 }
  0xd9   : > { %v1166_v23 = vsel %vm1160_vm10, %v1157_v20, %v1086_v38 }
  0xda   : > { %v980_v2 = vpop.permute.xlu2 %979 }
  0xdb   : > { %v958_v34 = vpop.permute.xlu0 %957 }
  0xdc   : > { %v1105_v58 = vsel %vm1102_vm4, %v933_v4, %v958_v34 }
  0xdf   : > { %v960_v8 = vpop.permute.xlu1 %959 }
  0xe0   : > { %v1108_v15 = vsel %vm1102_vm4, %v934_v46, %v960_v8 }
  0xe1   : > { %v1119_v29 = vsel %vm1115_vm5, %v1108_v15, %v980_v2 }
  0xe2   : > { %v1006_v61 = vpop.permute.xlu2 %1005 }
  0xe3   : > { %v1088_v18 = vpop.permute.xlu0 %1087 }
  0xe4   : > { %v1168_v14 = vsel %vm1160_vm10, %v1159_v27, %v1088_v18 }
  0xe7   : > { %v978_v6 = vpop.permute.xlu1 %977 }
  0xe8   : > { %v1117_v52 = vsel %vm1115_vm5, %v1105_v58, %v978_v6 }
  0xe9   : > { %v1126_v33 = vsel %vm1124_vm6, %v1117_v52, %v1006_v61 }
  0xea   : > { %v1036_v9 = vpop.permute.xlu2 %1035 }
  0xeb   : > { %v1099_v25 = vpop.permute.xlu0 %1098 }
  0xec   : > { %v1175_v26 = vsel %vm1169_vm11, %v1166_v23, %v1099_v25 }
  0xed   : > { %1535 = vmatmul.msk.bf16.vlgmr.msra.gmra.mxu2 %vm1218_vm12, %v1175_v26 }
  0xef   : > { %v1101_v28 = vpop.permute.xlu1 %1100 }
  0xf0   : > { %v1177_v5 = vsel %vm1169_vm11, %v1168_v14, %v1101_v28 }
  0xf1   : > { %1536 = vmatmul.msk.bf16.vlgmr.msra.gmra.mxu3 %vm1218_vm12, %v1177_v5 }
  0xf2   : > { %v1068_v56 = vpop.permute.xlu2 %1067 }
  0xf3   : > { %v1008_v37 = vpop.permute.xlu0 %1007 }
  0xf4   : > { %v1128_v54 = vsel %vm1124_vm6, %v1119_v29, %v1008_v37 }
  0xf5   : > { %v1137_v43 = vsel %vm1133_vm7, %v1128_v54, %v1036_v9 }
  0xf7   : > { %v1034_v42 = vpop.permute.xlu1 %1033 }
  0xf8   : > { %v1135_v50 = vsel %vm1133_vm7, %v1126_v33, %v1034_v42 }
  0xfa   : > { %v1084_v36 = vpop.permute.xlu2 %1083 }
  0xfb   : > { %v1054_v45 = vpop.permute.xlu0 %1053 }
  0xfc   : > { %v1144_v62 = vsel %vm1142_vm8, %v1135_v50, %v1054_v45 }
  0xfd   : > { %v1153_v47 = vsel %vm1151_vm9, %v1144_v62, %v1068_v56 }
  0xff   : > { %v1056_v30 = vpop.permute.xlu1 %1055 }
 0x100   : > { %v1146_v31 = vsel %vm1142_vm8, %v1137_v43, %v1056_v30 }
 0x103   : > { %v1070_v24 = vpop.permute.xlu0 %1069 }
 0x104   : > { %v1155_v44 = vsel %vm1151_vm9, %v1146_v31, %v1070_v24 }
 0x105   : > { %v1164_v63 = vsel %vm1160_vm10, %v1155_v44, %v1084_v36 }
 0x107   : > { %v1082_v35 = vpop.permute.xlu1 %1081 }
 0x108   : > { %v1162_v32 = vsel %vm1160_vm10, %v1153_v47, %v1082_v35 }
 0x10b   : > { %v1095_v41 = vpop.permute.xlu0 %1094 }
 0x10c   : > { %v1171_v39 = vsel %vm1169_vm11, %v1162_v32, %v1095_v41 }
 0x10d   : > { %1533 = vmatmul.msk.bf16.vlgmr.msra.gmra.mxu0 %vm1218_vm12, %v1171_v39 }
 0x10f   : > { %v1097_v21 = vpop.permute.xlu1 %1096 }
 0x110   : > { %v1173_v48 = vsel %vm1169_vm11, %v1164_v63, %v1097_v21 }
 0x111   : > { %1534 = vmatmul.msk.bf16.vlgmr.msra.gmra.mxu1 %vm1218_vm12, %v1173_v48 }
 0x170   : > { %v1250_v51 = vpop.f32.mrf.mxu2 }
 0x171   : > { %v1251_v57 = vadd.f32 %v1671_v53, %v1250_v51 }
 0x173   : > { %v1264_v10 = vmax.f32 %v1251_v57, 0.0 }
 0x174   : > { %v1255_v55 = vpop.f32.mrf.mxu3 }
 0x175   : > { %v1256_v0 = vadd.f32 %v1671_v53, %v1255_v55 }
 0x177   : > { %v1266_v8 = vmax.f32 %v1256_v0, 0.0 }
 0x178   : > { %v1252_v59 = vpop.f32.mrf.mxu2 }
 0x179   : > { %v1253_v60 = vadd.f32 %v1671_v53, %v1252_v59 }
 0x17b   : > { %v1265_v34 = vmax.f32 %v1253_v60, 0.0 }
 0x17c   : > { %v1257_v38 = vpop.f32.mrf.mxu3 }
 0x17d   : > { %v1565_v1 = vpack.c.bf16 %v1265_v34, %v1264_v10  ;;  %v1258_v3 = vadd.f32 %v1671_v53, %v1257_v38 }
 0x17f   : > { %1573 = vst [vmem:[%s622_s15 + $0x10] sm:$0xff] %v1565_v1   ;;  %v1267_v11 = vmax.f32 %v1258_v3, 0.0 }
 0x181   : > { %v1570_v12 = vpack.c.bf16 %v1267_v11, %v1266_v8 }
 0x183   : > { %1574 = vst [vmem:[%s622_s15 + $0x18] sm:$0xff] %v1570_v12  }
 0x18a   : > { %v1240_v49 = vpop.f32.mrf.mxu0 }
 0x18b   : > { %v1241_v16 = vadd.f32 %v1671_v53, %v1240_v49 }
 0x18d   : > { %v1260_v7 = vmax.f32 %v1241_v16, 0.0 }
 0x18e   : > { %v1245_v18 = vpop.f32.mrf.mxu1 }
 0x18f   : > { %v1246_v19 = vadd.f32 %v1671_v53, %v1245_v18 }
 0x191   : > { %v1262_v23 = vmax.f32 %v1246_v19, 0.0 }
 0x192   : > { %v1242_v17 = vpop.f32.mrf.mxu0 }
 0x193   : > { %v1243_v2 = vadd.f32 %v1671_v53, %v1242_v17 }
 0x195   : > { %v1261_v6 = vmax.f32 %v1243_v2, 0.0 }
 0x196   : > { %v1247_v20 = vpop.f32.mrf.mxu1 }
 0x197   : > { %v1555_v22 = vpack.c.bf16 %v1261_v6, %v1260_v7  ;;  %v1248_v13 = vadd.f32 %v1671_v53, %v1247_v20 }
 0x199   : > { %1556 = vst [vmem:[%s622_s15] sm:$0xff] %v1555_v22   ;;  %v1263_v25 = vmax.f32 %v1248_v13, 0.0 }
 0x19b   : > { %v1560_v26 = vpack.c.bf16 %v1263_v25, %v1262_v23 }
 0x19d   : > { %1572 = vst [vmem:[%s622_s15 + $0x8] sm:$0xff] %v1560_v26  }
 0x19e PF: > { %s14_s19 = sadd.s32 1, %s1726_s19   ;;  %s2314_s15 = smov %s1714_s16 }
 0x19f   : > { %p11_p12 = scmp.ge.s32.totalorder %s14_s19, 4   ;;  %s2315_s16 = smov %s1816_s24 }
 0x1a0   : > { %s2316_s17 = smov %s1722_s18  ;;  %s2317_s18 = smov %s2319_s20 }
 0x1a1   :  { %13 = sbr.rel (!%p11_p12) target bundleno = 3 (0x3), region = 218 }

// kernel: _forward_impl.3
= control target key start
LH: loop header
LB: loop body
LE: loop exit
PB: predicated region body
PF: predicated region fallthrough
CT: control target
= control target key end

     0   :  { %s1545_s15 = smov 0   ;;  %s1547_s16 = smov 0   ;;  %s1857_s0 = inlined_call_operand.vmem [shape: bf16[2,4,5,5,32], index: 0, kind: input, shape index: {}, may-alias: {0,1}]   ;;  %s1858_s1 = inlined_call_operand.vmem [shape: bf16[2,4,5,5,32], index: 1, kind: input, shape index: {}, may-alias: {0,1}]   ;;  %s1859_s2 = inlined_call_operand.vmem [shape: bf16[288,128], index: 2, kind: input, shape index: {}]   ;;  %s1860_s3 = inlined_call_operand.vmem [shape: f32[1,128], index: 3, kind: input, shape index: {}]   ;;  %s1861_s4 = inlined_call_operand.vmem [shape: bf16[2,4,4,128], index: 4, kind: output, shape index: {}]  }
   0x1   :  { %s1549_s17 = smov 0   ;;  %s1551_s18 = smov 0  }
   0x2   :  { %s1553_s19 = smov 0  }
   0x3 LB: > { %s26_s20 = sadd.s32 1, %s1507_s18  ;;  %p42_p1 = scmp.ne.s32.totalorder %s1499_s16, %s1495_s15  ;;  %s1511_s19 = sphi %s1553_s19, %s14_s19   ;;  %s1507_s18 = sphi %s1551_s18, %s1868_s18   ;;  %s1503_s17 = sphi %s1549_s17, %s1867_s17   ;;  %s1499_s16 = sphi %s1547_s16, %s1866_s16   ;;  %s1495_s15 = sphi %s1545_s15, %s1865_s15  }
   0x4   : > { %p28_p0 = scmp.ge.s32.totalorder %s26_s20, 2  ;;  %p43_p2 = scmp.eq.s32.totalorder %s1511_s19, 0 }
   0x5   : > { %s35_s23 = sadd.s32 1, %s1499_s16  ;;  %p1264_p5 = scmp.ge.s32.totalorder %s1511_s19, 2 }
   0x6   : > { %s1870_s20 = smov (%p28_p0, %s26_s20), 0  ;;  %p1576_p3 = por %p43_p2, %p42_p1 }
   0x7   : > { %s30_s22 = ssub.s32 %s1507_s18, %s1870_s20  ;;  %176 = sbr.rel (%p1264_p5) target bundleno = 43 (0x2b), region = 24 }
   0x8   : > { %p33_p4 = scmp.eq.s32.totalorder %s30_s22, 0 }
   0xa   : > { %s1584_s24 = scalar_select %p33_p4, %s1499_s16, %s35_s23  }
   0xc   : > { %179 = sbr.rel (!%p1576_p3) target bundleno = 34 (0x22), region = 28  ;;  %s181_s25 = sand.u32 (%p1576_p3), 1, %s1499_s16  }
   0xd   : > { %s1380_s26 = smul.u32 (%p1576_p3), 80, %s1507_s18  ;;  %s1265_s27 = sshll.u32 (%p1576_p3), %s181_s25, 6 }
   0xe   : > { %s1596_s5 = scalar_lea.vmem (%p1576_p3), [#allocation2], %s1265_s27   ;;  %s1598_s6 = smov (%p1576_p3), 0  }
   0xf   : > { %s1594_s30 = scalar_lea.vmem (%p1576_p3), %s1857_s0, %s1380_s26  }
  0x11 LB: >> { %v213_v0 = vld [vmem:[%s1594_s30] sm:$0xf]  ;;  %v215_v1 = vld [vmem:[%s1594_s30 + $0x4] sm:$0xf]  ;;  %v217_v2 = vld [vmem:[%s1594_s30 + $0x8] sm:$0xf]  ;;  %s1515_s6 = sphi %s1598_s6, %s207_s6  }
  0x12   : >> { %214 = vst [vmem:[%s1596_s5] sm:$0xf] %v213_v0  ;;  %v219_v3 = vld [vmem:[%s1594_s30 + $0xc] sm:$0xf]  ;;  %v221_v4 = vld [vmem:[%s1594_s30 + $0x14] sm:$0xf]  ;;  %s207_s6 = sadd.s32 1, %s1515_s6  }
  0x13   : >> { %216 = vst [vmem:[%s1596_s5 + $0x4] sm:$0xf] %v215_v1  ;;  %v223_v5 = vld [vmem:[%s1594_s30 + $0x18] sm:$0xf]  ;;  %v225_v6 = vld [vmem:[%s1594_s30 + $0x1c] sm:$0xf] }
  0x14   : >> { %218 = vst [vmem:[%s1596_s5 + $0x8] sm:$0xf] %v217_v2  ;;  %v227_v7 = vld [vmem:[%s1594_s30 + $0x20] sm:$0xf]  ;;  %v229_v8 = vld [vmem:[%s1594_s30 + $0x28] sm:$0xf] }
  0x15   : >> { %220 = vst [vmem:[%s1596_s5 + $0xc] sm:$0xf] %v219_v3  ;;  %v231_v9 = vld [vmem:[%s1594_s30 + $0x2c] sm:$0xf]  ;;  %v233_v10 = vld [vmem:[%s1594_s30 + $0x30] sm:$0xf] }
  0x16   : >> { %222 = vst [vmem:[%s1596_s5 + $0x10] sm:$0xf] %v221_v4  ;;  %v235_v11 = vld [vmem:[%s1594_s30 + $0x34] sm:$0xf]  ;;  %v237_v12 = vld [vmem:[%s1594_s30 + $0x3c] sm:$0xf] }
  0x17   : >> { %224 = vst [vmem:[%s1596_s5 + $0x14] sm:$0xf] %v223_v5  ;;  %v239_v13 = vld [vmem:[%s1594_s30 + $0x40] sm:$0xf]  ;;  %v241_v14 = vld [vmem:[%s1594_s30 + $0x44] sm:$0xf] }
  0x18   : >> { %226 = vst [vmem:[%s1596_s5 + $0x18] sm:$0xf] %v225_v6  ;;  %v243_v15 = vld [vmem:[%s1594_s30 + $0x48] sm:$0xf]  ;;  %p206_p6 = scmp.ge.s32.totalorder %s207_s6, 1 }
  0x19   : >> { %228 = vst [vmem:[%s1596_s5 + $0x1c] sm:$0xf] %v227_v7 }
  0x1a   : >> { %230 = vst [vmem:[%s1596_s5 + $0x20] sm:$0xf] %v229_v8 }
  0x1b   : >> { %232 = vst [vmem:[%s1596_s5 + $0x24] sm:$0xf] %v231_v9 }
  0x1c   : >> { %234 = vst [vmem:[%s1596_s5 + $0x28] sm:$0xf] %v233_v10 }
  0x1d   : >> { %236 = vst [vmem:[%s1596_s5 + $0x2c] sm:$0xf] %v235_v11  ;;  %209 = sbr.rel (!%p206_p6) target bundleno = 17 (0x11), region = 223 }
  0x1e   : >> { %238 = vst [vmem:[%s1596_s5 + $0x30] sm:$0xf] %v237_v12 }
  0x1f   : >> { %240 = vst [vmem:[%s1596_s5 + $0x34] sm:$0xf] %v239_v13 }
  0x20   : >> { %242 = vst [vmem:[%s1596_s5 + $0x38] sm:$0xf] %v241_v14 }
  0x21   : >> { %244 = vst [vmem:[%s1596_s5 + $0x3c] sm:$0xf] %v243_v15 }
  0x22 PF: > { %410 = sbr.rel (!%p1576_p3) target bundleno = 43 (0x2b), region = 90  ;;  %s412_s7 = sand.u32 (%p1576_p3), 1, %s1499_s16  }
  0x23   : > { %s1276_s8 = smul.u32 (%p1576_p3), 80, %s1507_s18  ;;  %s1275_s9 = sshll.u32 (%p1576_p3), %s412_s7, 4 }
  0x24   : > { %s414_s13 = scalar_lea.vmem (%p1576_p3), [#allocation3], %s1275_s9 }
  0x25   : > { %s1168_s12 = scalar_lea.vmem (%p1576_p3), %s1858_s1, %s1276_s8 }
  0x26   : > { %v1277_v16 = vld [vmem:[%s1168_s12 + $0x10] sm:$0xf] (%p1576_p3)  ;;  %v1278_v17 = vld [vmem:[%s1168_s12 + $0x24] sm:$0xf] (%p1576_p3)  ;;  %v1279_v18 = vld [vmem:[%s1168_s12 + $0x38] sm:$0xf] (%p1576_p3) }
  0x27   : > { %438 = vst [vmem:[%s414_s13] sm:$0xf] %v1277_v16  ;;  %v1280_v19 = vld [vmem:[%s1168_s12 + $0x4c] sm:$0xf] }
  0x28   : > { %440 = vst [vmem:[%s414_s13 + $0x4] sm:$0xf] %v1278_v17 }
  0x29   : > { %442 = vst [vmem:[%s414_s13 + $0x8] sm:$0xf] %v1279_v18 }
  0x2a   : > { %444 = vst [vmem:[%s414_s13 + $0xc] sm:$0xf] %v1280_v19 }
  0x2b PF: > { %p1281_p7 = scmp.ge.s32.totalorder %s1511_s19, 1  ;;  %p475_p8 = scmp.lt.s32.totalorder %s1511_s19, 3 }
  0x2d   : > { %p476_p9 = pnand %p1281_p7, %p475_p8 }
  0x2e   : > { %s482_s14 = sand.u32 (!%p476_p9), 1, %s1495_s15   ;;  %s1517_s23 = smov (!%p476_p9), 32  }
  0x2f   : > { %479 = sbr.rel (%p476_p9) target bundleno = 382 (0x17e), region = 131  ;;  %s1282_s21 = sshll.u32 (!%p476_p9), %s482_s14, 6 }
  0x30   : > { %s1650_s22 = scalar_lea.vmem (!%p476_p9), [#allocation2], %s1282_s21  ;;  %s1518_s25 = smov (!%p476_p9), 64  }
  0x31   : > { %s1736_s26 = sshll.u32 (!%p476_p9), %s482_s14, 4  ;;  %s1519_s15 = smov (!%p476_p9), 96  }
  0x32   : > { %s491_s27 = scalar_lea.vmem (!%p476_p9), [#allocation3], %s1736_s26  ;;  %p530_p10 = scmp.lt.s32.totalorder (!%p476_p9), %s1503_s17, 1 }
  0x34   : > { %v540_v20 = vld [vmem:[%s1650_s22] sm:$0x7]  ;;  %v1654_v21 = vld [vmem:[%s1650_s22 + $0x4] sm:$0x7]  ;;  %v1657_v22 = vld [vmem:[%s1650_s22 + $0x8] sm:$0x7] }
  0x35   : > { %v1660_v23 = vld [vmem:[%s1650_s22 + $0xc] sm:$0x7]  ;;  %756 = vst [vmem:[#allocation1] ss:$4 sm:$0xff] %v540_v20  ;;  %vm566_vm0 = vcmask 1041408   ;;  %vm570_vm1 = vcmask 1043458  }
  0x36   : > { %758 = vst [vmem:[#allocation1 + $0x1] ss:$4 sm:$0xff] %v1654_v21  ;;  %v562_v24 = vrot.slane %v540_v20, 2  ;;  %v563_v25 = vrot.slane %v1654_v21, 2  ;;  %v564_v26 = vrot.slane %v1657_v22, 2  ;;  %v565_v27 = vrot.slane %v1660_v23, 2 }
  0x37   : > { %760 = vst [vmem:[#allocation1 + $0x2] ss:$4 sm:$0xff] %v1657_v22  ;;  %vm592_vm2 = vsmask.f32 1280  ;;  %vm593_vm3 = vsmask.f32 3336 }
  0x38   : > { %762 = vst [vmem:[#allocation1 + $0x3] ss:$4 sm:$0xff] %v1660_v23  ;;  %v569_v28 = vsel %vm566_vm0, %v540_v20, %v562_v24  ;;  %v571_v29 = vsel %vm570_vm1, %v540_v20, %v562_v24  ;;  %v576_v30 = vsel %vm566_vm0, %v1654_v21, %v563_v25  ;;  %v582_v31 = vsel %vm566_vm0, %v1657_v22, %v564_v26  ;;  %v544_v39 = vld [vmem:[%s1650_s22 + $0x10] sm:$0x7]  ;;  %v1684_v44 = vld [vmem:[%s1650_s22 + $0x14] sm:$0x7]  ;;  %vm594_vm5 = vmor %vm592_vm2, %vm593_vm3 }
  0x39   : > { %v573_v32 = vrot.slane %v571_v29, 2  ;;  %v577_v33 = vsel %vm570_vm1, %v1654_v21, %v563_v25  ;;  %vm595_vm4 = vsmask.f32 5392  ;;  %v599_v34 = vshrl.u32 %v569_v28, 16  ;;  %v1687_v49 = vld [vmem:[%s1650_s22 + $0x18] sm:$0x7] }
  0x3a   : > { %v583_v35 = vsel %vm570_vm1, %v1657_v22, %v564_v26  ;;  %v589_v36 = vsel %vm570_vm1, %v1660_v23, %v565_v27  ;;  %v602_v37 = vshll.u32 %v569_v28, 16  ;;  %v612_v38 = vshrl.u32 %v576_v30, 16  ;;  %v1694_v58 = vld [vmem:[%s1650_s22 + $0x1c] sm:$0x7]  ;;  %vm596_vm6 = vmor %vm594_vm5, %vm595_vm4  ;;  %v548_v19 = vld [vmem:[%s1650_s22 + $0x20] sm:$0x7] }
  0x3b   : > { %v588_v40 = vsel %vm566_vm0, %v1660_v23, %v565_v27  ;;  %v601_v41 = vrot.slane %v599_v34, 6  ;;  %v615_v42 = vshll.u32 %v576_v30, 16  ;;  %v625_v43 = vshrl.u32 %v582_v31, 16  ;;  %v549_v20 = vld [vmem:[%s1650_s22 + $0x24] sm:$0x7]  ;;  %s1872_s17 = smov (!%p530_p10, %s1503_s17), 1 }
  0x3c   : > { %v579_v45 = vrot.slane %v577_v33, 2  ;;  %v604_v46 = vrot.slane %v602_v37, 7  ;;  %v614_v47 = vrot.slane %v612_v38, 6  ;;  %v628_v48 = vshll.u32 %v582_v31, 16  ;;  %v550_v25 = vld [vmem:[%s1650_s22 + $0x28] sm:$0x7] }
  0x3d   : > { %v585_v50 = vrot.slane %v583_v35, 2  ;;  %v591_v51 = vrot.slane %v589_v36, 2  ;;  %v617_v52 = vrot.slane %v615_v42, 7  ;;  %v627_v53 = vrot.slane %v625_v43, 6  ;;  %v551_v27 = vld [vmem:[%s1650_s22 + $0x2c] sm:$0x7] }
  0x3e   : > { %v630_v55 = vrot.slane %v628_v48, 7  ;;  %v638_v56 = vshrl.u32 %v588_v40, 16  ;;  %v641_v57 = vshll.u32 %v588_v40, 16  ;;  %v605_v59 = vor.u32 %v604_v46, %v601_v41  ;;  %v1367_v7 = vld [vmem:[%s1859_s2 + $0x28] sm:$0xff] }
  0x3f   : > { %v1689_v54 = vld.sshfl [vmem:[#allocation1] sm:$0xff pattern:$0x73625140]  ;;  %v608_v60 = vshll.u32 %v573_v32, 16  ;;  %v618_v61 = vor.u32 %v617_v52, %v614_v47  ;;  %v621_v62 = vshll.u32 %v579_v45, 16  ;;  %v634_v2 = vshll.u32 %v585_v50, 16 }
  0x40   : > { %765 = vst [vmem:[#allocation1] ss:$4 sm:$0xff] %v544_v39  ;;  %v640_v63 = vrot.slane %v638_v56, 6  ;;  %v643_v0 = vrot.slane %v641_v57, 7  ;;  %vm597_vm7 = vsmask.f32 7448  ;;  %v631_v1 = vor.u32 %v630_v55, %v627_v53 }
  0x41   : > { %768 = vst [vmem:[#allocation1 + $0x1] ss:$4 sm:$0xff] %v1684_v44  ;;  %v647_v4 = vshll.u32 %v591_v51, 16  ;;  %v606_v5 = vrot.slane %v605_v59, 2  ;;  %v610_v6 = vrot.slane %v608_v60, 7  ;;  %vm1700_vm8 = vmor %vm596_vm6, %vm597_vm7  ;;  %v619_v8 = vrot.slane %v618_v61, 2 }
  0x42   : > { %771 = vst [vmem:[#allocation1 + $0x2] ss:$4 sm:$0xff] %v1687_v49  ;;  %v644_v3 = vor.u32 %v643_v0, %v640_v63  ;;  %v623_v9 = vrot.slane %v621_v62, 7  ;;  %v632_v10 = vrot.slane %v631_v1, 2  ;;  %v636_v11 = vrot.slane %v634_v2, 7 }
  0x43   : > { %774 = vst [vmem:[#allocation1 + $0x3] ss:$4 sm:$0xff] %v1694_v58  ;;  %v649_v13 = vrot.slane %v647_v4, 7  ;;  %v611_v14 = vsel %vm1700_vm8, %v606_v5, %v610_v6  ;;  %v655_v24 = vrot.slane %v548_v19, 2  ;;  %v656_v26 = vrot.slane %v549_v20, 2 }
  0x44   : > { %v645_v12 = vrot.slane %v644_v3, 2  ;;  %v1708_v15 = vsel %vm1700_vm8, %v619_v8, %v623_v9  ;;  %v1712_v17 = vsel %vm1700_vm8, %v632_v10, %v636_v11  ;;  %v657_v28 = vrot.slane %v550_v25, 2  ;;  %v552_v53 = vld [vmem:[%s1650_s22 + $0x30] sm:$0x7]  ;;  %v553_v59 = vld [vmem:[%s1650_s22 + $0x34] sm:$0x7] }
  0x45   : > { %v658_v30 = vrot.slane %v551_v27, 2  ;;  %v661_v31 = vsel %vm566_vm0, %v548_v19, %v655_v24  ;;  %v667_v32 = vsel %vm566_vm0, %v549_v20, %v656_v26  ;;  %v662_v34 = vsel %vm570_vm1, %v548_v19, %v655_v24  ;;  %v554_v60 = vld [vmem:[%s1650_s22 + $0x38] sm:$0x7]  ;;  %v555_v3 = vld [vmem:[%s1650_s22 + $0x3c] sm:$0x7] }
  0x46   : > { %v1717_v18 = vsel %vm1700_vm8, %v645_v12, %v649_v13  ;;  %v673_v33 = vsel %vm566_vm0, %v550_v25, %v657_v28  ;;  %v683_v36 = vshrl.u32 %v661_v31, 16  ;;  %v686_v37 = vshll.u32 %v661_v31, 16  ;;  %v556_v11 = vld [vmem:[%s491_s27] sm:$0x7] }
  0x47   : > { %v679_v35 = vsel %vm566_vm0, %v551_v27, %v658_v30  ;;  %v668_v38 = vsel %vm570_vm1, %v549_v20, %v656_v26  ;;  %v696_v39 = vshrl.u32 %v667_v32, 16  ;;  %v699_v40 = vshll.u32 %v667_v32, 16 }
  0x48   : > { %v674_v41 = vsel %vm570_vm1, %v550_v25, %v657_v28  ;;  %v709_v42 = vshrl.u32 %v673_v33, 16  ;;  %v712_v43 = vshll.u32 %v673_v33, 16  ;;  %v664_v45 = vrot.slane %v662_v34, 2 }
  0x49   : > { %v722_v46 = vshrl.u32 %v679_v35, 16  ;;  %v725_v47 = vshll.u32 %v679_v35, 16  ;;  %v670_v48 = vrot.slane %v668_v38, 2  ;;  %v680_v50 = vsel %vm570_vm1, %v551_v27, %v658_v30 }
  0x4a   : > { %v775_v16 = vld.sshfl [vmem:[#allocation1] sm:$0xff pattern:$0x73625140]  ;;  %v685_v51 = vrot.slane %v683_v36, 6  ;;  %v688_v52 = vrot.slane %v686_v37, 7  ;;  %v676_v55 = vrot.slane %v674_v41, 2 }
  0x4b   : > { %777 = vrot.lane.b32.xlu0 %v775_v16, %s1517_s23  ;;  %780 = vst [vmem:[#allocation1] ss:$4 sm:$0xff] %v611_v14  ;;  %v698_v56 = vrot.slane %v696_v39, 6  ;;  %v701_v57 = vrot.slane %v699_v40, 7  ;;  %v711_v61 = vrot.slane %v709_v42, 6  ;;  %v714_v62 = vrot.slane %v712_v43, 7 }
  0x4c   : > { %783 = vst [vmem:[#allocation1 + $0x1] ss:$4 sm:$0xff] %v1708_v15  ;;  %v682_v0 = vrot.slane %v680_v50, 2  ;;  %v724_v1 = vrot.slane %v722_v46, 6  ;;  %v727_v2 = vrot.slane %v725_v47, 7  ;;  %v689_v4 = vor.u32 %v688_v52, %v685_v51  ;;  %v1369_v47 = vld [vmem:[%s1859_s2 + $0x38] sm:$0xff] }
  0x4d   : > { %786 = vst [vmem:[#allocation1 + $0x2] ss:$4 sm:$0xff] %v1712_v17  ;;  %v692_v5 = vshll.u32 %v664_v45, 16  ;;  %v705_v6 = vshll.u32 %v670_v48, 16  ;;  %v702_v8 = vor.u32 %v701_v57, %v698_v56  ;;  %v718_v9 = vshll.u32 %v676_v55, 16  ;;  %v1377_v48 = vld [vmem:[%s1859_s2 + $0x78] sm:$0xff]  ;;  %1031 = vmatpush.bf16.msra.mxu0 %v1369_v47 }
  0x4e   : > { %789 = vst [vmem:[#allocation1 + $0x3] ss:$4 sm:$0xff] %v1717_v18  ;;  %v715_v10 = vor.u32 %v714_v62, %v711_v61  ;;  %v728_v12 = vor.u32 %v727_v2, %v724_v1  ;;  %v731_v13 = vshll.u32 %v682_v0, 16  ;;  %v736_v14 = vrot.slane %v556_v11, 2  ;;  %v1368_v50 = vld [vmem:[%s1859_s2 + $0x30] sm:$0xff]  ;;  %1045 = vmatpush.bf16.msra.mxu1 %v1377_v48  ;;  %v1366_v52 = vld [vmem:[%s1859_s2 + $0x20] sm:$0xff] }
  0x4f   : > { %v690_v16 = vrot.slane %v689_v4, 2  ;;  %v703_v24 = vrot.slane %v702_v8, 2  ;;  %v1373_v56 = vld [vmem:[%s1859_s2 + $0x58] sm:$0xff]  ;;  %v1378_v57 = vld [vmem:[%s1859_s2 + $0x80] sm:$0xff]  ;;  %vm864_vm9 = vcmask 261120   ;;  %v1371_v61 = vld [vmem:[%s1859_s2 + $0x48] sm:$0xff] }
  0x50   : > { %v739_v26 = vsel %vm566_vm0, %v556_v11, %v736_v14  ;;  %v716_v28 = vrot.slane %v715_v10, 2  ;;  %v729_v32 = vrot.slane %v728_v12, 2  ;;  %v733_v33 = vrot.slane %v731_v13, 7 }
  0x51   : > { %v743_v30 = vshrl.u32 %v739_v26, 16  ;;  %v746_v31 = vshll.u32 %v739_v26, 16  ;;  %1032 = vmatpush.bf16.msra.mxu0 %v1368_v50  ;;  %vm867_vm10 = vcmask 523264   ;;  %vm870_vm11 = vcmask 785408  }
  0x52   : > { %v734_v43 = vsel %vm1700_vm8, %v729_v32, %v733_v33 }
  0x53   : > { %v745_v35 = vrot.slane %v743_v30, 6  ;;  %v748_v36 = vrot.slane %v746_v31, 7 }
  0x55   : > { %v790_v29 = vld.sshfl [vmem:[#allocation1] sm:$0xff pattern:$0x73625140]  ;;  %v749_v41 = vor.u32 %v748_v36, %v745_v35  ;;  %1033 = vmatpush.bf16.msra.mxu0 %v1367_v7 }
  0x56   : > { %792 = vrot.lane.b32.xlu0 %v790_v29, %s1518_s25  ;;  %794 = vst [vmem:[#allocation1] ss:$4 sm:$0xff] %v548_v19  ;;  %v694_v19 = vrot.slane %v692_v5, 7 }
  0x57   : > { %796 = vst [vmem:[#allocation1 + $0x1] ss:$4 sm:$0xff] %v549_v20  ;;  %v707_v20 = vrot.slane %v705_v6, 7  ;;  %v750_v45 = vrot.slane %v749_v41, 2 }
  0x58   : > { %798 = vst [vmem:[#allocation1 + $0x2] ss:$4 sm:$0xff] %v550_v25  ;;  %v720_v25 = vrot.slane %v718_v9, 7  ;;  %v695_v34 = vsel %vm1700_vm8, %v690_v16, %v694_v19 }
  0x59   : > { %800 = vst [vmem:[#allocation1 + $0x3] ss:$4 sm:$0xff] %v551_v27  ;;  %v740_v27 = vsel %vm570_vm1, %v556_v11, %v736_v14  ;;  %v708_v38 = vsel %vm1700_vm8, %v703_v24, %v707_v20  ;;  %1034 = vmatpush.bf16.msra.mxu0 %v1366_v52 }
  0x5a   : > { %v742_v29 = vrot.slane %v740_v27, 2  ;;  %v721_v39 = vsel %vm1700_vm8, %v716_v28, %v720_v25 }
  0x5c   : > { %v752_v37 = vshll.u32 %v742_v29, 16 }
  0x5e   : > { %v754_v42 = vrot.slane %v752_v37, 7 }
  0x60   : > { %v801_v63 = vld.sshfl [vmem:[#allocation1] sm:$0xff pattern:$0x73625140]  ;;  %v755_v46 = vsel %vm1700_vm8, %v750_v45, %v754_v42 }
  0x61   : > { %803 = vrot.lane.b32.xlu1 %v801_v63, %s1519_s15  ;;  %806 = vst [vmem:[#allocation1] ss:$4 sm:$0xff] %v552_v53  ;;  %v1365_v53 = vld [vmem:[%s1859_s2 + $0x18] sm:$0xff]  ;;  %v1370_v63 = vld [vmem:[%s1859_s2 + $0x40] sm:$0xff] }
  0x62   : > { %809 = vst [vmem:[#allocation1 + $0x1] ss:$4 sm:$0xff] %v553_v59  ;;  %1035 = vmatpush.bf16.msra.mxu0 %v1365_v53 }
  0x63   : > { %812 = vst [vmem:[#allocation1 + $0x2] ss:$4 sm:$0xff] %v554_v60  ;;  %v1372_v60 = vld [vmem:[%s1859_s2 + $0x50] sm:$0xff] }
  0x64   : > { %815 = vst [vmem:[#allocation1 + $0x3] ss:$4 sm:$0xff] %v555_v3 }
  0x6b   : > { %v1755_v40 = vld.sshfl [vmem:[#allocation1] sm:$0xff pattern:$0x73625140] }
  0x6c   : > { %818 = vst [vmem:[#allocation1] ss:$4 sm:$0xff] %v695_v34 }
  0x6d   : > { %821 = vst [vmem:[#allocation1 + $0x1] ss:$4 sm:$0xff] %v708_v38 }
  0x6e   : > { %824 = vst [vmem:[#allocation1 + $0x2] ss:$4 sm:$0xff] %v721_v39 }
  0x6f   : > { %827 = vst [vmem:[#allocation1 + $0x3] ss:$4 sm:$0xff] %v734_v43 }
  0x76   : > { %v828_v51 = vld.sshfl [vmem:[#allocation1] sm:$0xff pattern:$0x73625140] }
  0x77   : > { %830 = vrot.lane.b32.xlu1 %v828_v51, %s1517_s23  ;;  %832 = vst [vmem:[#allocation1] ss:$4 sm:$0xff] %v1654_v21  ;;  %v557_v21 = vld [vmem:[%s491_s27 + $0x4] sm:$0x7]  ;;  %s1361_s27 = sshll.u32 %s1872_s17, 3 }
  0x78   : > { %834 = vst [vmem:[#allocation1 + $0x1] ss:$4 sm:$0xff] %v1657_v22  ;;  %v1364_v22 = vld [vmem:[%s1859_s2 + $0x10] sm:$0xff]  ;;  %s537_s29 = scalar_lea.vmem %s1861_s4, %s1361_s27 }
  0x79   : > { %836 = vst [vmem:[#allocation1 + $0x2] ss:$4 sm:$0xff] %v1660_v23  ;;  %1036 = vmatpush.bf16.msra.mxu0 %v1364_v22 }
  0x7a   : > { %838 = vst [vmem:[#allocation1 + $0x3] ss:$4 sm:$0xff] %v556_v11 }
  0x81   : > { %v839_v55 = vld.sshfl [vmem:[#allocation1] sm:$0xff pattern:$0x73625140] }
  0x82   : > { %841 = vrot.lane.b32.xlu2 %v839_v55, %s1518_s25  ;;  %843 = vst [vmem:[#allocation1] ss:$4 sm:$0xff] %v1684_v44  ;;  %v1376_v44 = vld [vmem:[%s1859_s2 + $0x70] sm:$0xff] }
  0x83   : > { %845 = vst [vmem:[#allocation1 + $0x1] ss:$4 sm:$0xff] %v1687_v49  ;;  %v1363_v49 = vld [vmem:[%s1859_s2 + $0x8] sm:$0xff]  ;;  %1046 = vmatpush.bf16.msra.mxu1 %v1376_v44 }
  0x84   : > { %847 = vst [vmem:[#allocation1 + $0x2] ss:$4 sm:$0xff] %v1694_v58  ;;  %1037 = vmatpush.bf16.msra.mxu0 %v1363_v49  ;;  %v1375_v58 = vld [vmem:[%s1859_s2 + $0x68] sm:$0xff] }
  0x85   : > { %850 = vst [vmem:[#allocation1 + $0x3] ss:$4 sm:$0xff] %v557_v21 }
  0x87   : > { %1047 = vmatpush.bf16.msra.mxu1 %v1375_v58 }
  0x8c   : > { %v851_v23 = vld.sshfl [vmem:[#allocation1] sm:$0xff pattern:$0x73625140] }
  0x8d   : > { %853 = vrot.lane.b32.xlu2 %v851_v23, %s1519_s15  ;;  %855 = vst [vmem:[#allocation1] ss:$4 sm:$0xff] %v1708_v15  ;;  %v1362_v15 = vld [vmem:[%s1859_s2] sm:$0xff] }
  0x8e   : > { %857 = vst [vmem:[#allocation1 + $0x1] ss:$4 sm:$0xff] %v1712_v17  ;;  %1038 = vmatpush.bf16.msra.mxu0 %v1362_v15  ;;  %v1374_v17 = vld [vmem:[%s1859_s2 + $0x60] sm:$0xff] }
  0x8f   : > { %859 = vst [vmem:[#allocation1 + $0x2] ss:$4 sm:$0xff] %v1717_v18  ;;  %v1379_v18 = vld [vmem:[%s1859_s2 + $0x88] sm:$0xff]  ;;  %1048 = vmatpush.bf16.msra.mxu1 %v1374_v17 }
  0x90   : > { %862 = vst [vmem:[#allocation1 + $0x3] ss:$4 sm:$0xff] %v755_v46  ;;  %1065 = vmatpush.bf16.msra.mxu2 %v1379_v18 }
  0x93   : > { %1049 = vmatpush.bf16.msra.mxu1 %v1373_v56 }
  0x94   : > { %1066 = vmatpush.bf16.msra.mxu2 %v1378_v57 }
  0x97   : > { %v863_v59 = vld.sshfl [vmem:[#allocation1] sm:$0xff pattern:$0x73625140]  ;;  %1050 = vmatpush.bf16.msra.mxu1 %v1372_v60 }
  0x98   : > { %1358 = vmatmul.msk.bf16.vlgmr.msra.gmra.mxu2 %vm864_vm9, %v863_v59 }
  0x9b   : > { %1051 = vmatpush.bf16.msra.mxu1 %v1371_v61 }
  0x9f   : > { %1052 = vmatpush.bf16.msra.mxu1 %v1370_v63 }
  0xbd   : > { %v778_v62 = vpop.permute.xlu0 %777 }
  0xbe   : > { %v866_v0 = vsel %vm864_vm9, %v1689_v54, %v778_v62  ;;  %v1456_v54 = vld [vmem:[%s1860_s3] ss:$0 sm:$0xff] }
  0xc8   : > { %v793_v1 = vpop.permute.xlu0 %792 }
  0xc9   : > { %v869_v2 = vsel %vm867_vm10, %v866_v0, %v793_v1 }
  0xd3   : > { %v804_v3 = vpop.permute.xlu1 %803 }
  0xd4   : > { %v872_v4 = vsel %vm870_vm11, %v869_v2, %v804_v3 }
  0xd5   : > { %1039 = vmatmul.bf16.vlgmr.msra.gmra.mxu0 %v872_v4 }
  0xdc   : > { %v842_v5 = vpop.permute.xlu2 %841 }
  0xe7   : > { %v854_v8 = vpop.permute.xlu2 %853 }
  0xe9   : > { %v831_v6 = vpop.permute.xlu1 %830 }
  0xea   : > { %v875_v9 = vsel %vm864_vm9, %v1755_v40, %v831_v6 }
  0xeb   : > { %v877_v10 = vsel %vm867_vm10, %v875_v9, %v842_v5 }
  0xec   : > { %v879_v11 = vsel %vm870_vm11, %v877_v10, %v854_v8 }
  0xed   : > { %1053 = vmatmul.bf16.vlgmr.msra.gmra.mxu1 %v879_v11 }
 0x11b   : > { %v1068_v14 = vpop.f32.mrf.mxu2 }
 0x123   : > { %v1070_v32 = vpop.f32.mrf.mxu2 }
 0x152   : > { %v1040_v12 = vpop.f32.mrf.mxu0 }
 0x153   : > { %v1041_v13 = vadd.f32 %v1456_v54, %v1040_v12 }
 0x15a   : > { %v1042_v24 = vpop.f32.mrf.mxu0 }
 0x15b   : > { %v1043_v26 = vadd.f32 %v1456_v54, %v1042_v24 }
 0x16a   : > { %v1054_v16 = vpop.f32.mrf.mxu1 }
 0x16b   : > { %v1055_v19 = vadd.f32 %v1054_v16, %v1041_v13 }
 0x16d   : > { %v1069_v20 = vadd.f32 %v1068_v14, %v1055_v19 }
 0x16f   : > { %v1073_v25 = vmax.f32 %v1069_v20, 0.0 }
 0x171   : > { %v1077_v27 = vrot.slane %v1073_v25, 4  ;;  %v1081_v28 = vpack.c.bf16 %v1073_v25, %v1073_v25 }
 0x172   : > { %v1056_v29 = vpop.f32.mrf.mxu1 }
 0x173   : > { %v1082_v30 = vpack.c.bf16 %v1077_v27, %v1077_v27  ;;  %1085 = vst [vmem:[%s537_s29] sm:$0x3] %v1081_v28  ;;  %v1057_v31 = vadd.f32 %v1056_v29, %v1043_v26 }
 0x175   : > { %1086 = vst [vmem:[%s537_s29 + $0x2] sm:$0x3] %v1082_v30  ;;  %v1071_v33 = vadd.f32 %v1070_v32, %v1057_v31 }
 0x177   : > { %v1074_v34 = vmax.f32 %v1071_v33, 0.0 }
 0x179   : > { %v1078_v35 = vrot.slane %v1074_v34, 4  ;;  %v1083_v36 = vpack.c.bf16 %v1074_v34, %v1074_v34 }
 0x17b   : > { %v1084_v37 = vpack.c.bf16 %v1078_v35, %v1078_v35  ;;  %1087 = vst [vmem:[%s537_s29 + $0x4] sm:$0x3] %v1083_v36 }
 0x17d   : > { %1088 = vst [vmem:[%s537_s29 + $0x6] sm:$0x3] %v1084_v37 }
 0x17e PF: > { %s14_s19 = sadd.s32 1, %s1511_s19   ;;  %s1865_s15 = smov %s1499_s16 }
 0x17f   : > { %p11_p11 = scmp.ge.s32.totalorder %s14_s19, 4   ;;  %s1866_s16 = smov %s1584_s24 }
 0x180   : > { %s1867_s17 = smov %s1507_s18  ;;  %s1868_s18 = smov %s1870_s20 }
 0x181   :  { %13 = sbr.rel (!%p11_p11) target bundleno = 3 (0x3), region = 245 }

</bundles_post_ra>
